<compile_context>
chip_gen: v7x
topology: tpu7x:2x2x1
jax: 0.10.0
libtpu: 0.0.40
codegen_flags: <defaults>
</compile_context>

<pallas_src>
import functools

import jax
import jax.numpy as jnp
from jax import lax
from jax.experimental import pallas as pl
from jax.experimental.pallas import tpu as pltpu

LN_EPS = 1e-5                      # torch nn.LayerNorm default
_SQRT1_2 = 0.7071067811865476


def _gelu(x):
    # exact erf-based GELU (torch nn.GELU() default).
    # TODO(synk): switch to the tanh approximation (EUP slot) if a bundle dump
    # shows the VALU slot saturating on the (R, Hc) gelu.
    return 0.5 * x * (1.0 + lax.erf(x * _SQRT1_2))


def _cdiv(a, b):
    return -(-a // b)


def _round_up(n, m):
    return _cdiv(n, m) * m


def _pad_to(a, shape):
    return jnp.pad(a, [(0, s - d) for d, s in zip(a.shape, shape)])


# ------------------------------ Pallas kernel ------------------------------
def mixer_kernel(x_ref, mask_ref,
                 ln1g_ref, ln1b_ref, w1a_ref, b1_ref, w2_ref, b2_ref,
                 ln2g_ref, ln2b_ref, wc1_ref, bc1_ref, wc2_ref, bc2_ref,
                 out_ref, *, lp, bb, hc, inv_c):
    f32, bf16 = jnp.float32, jnp.bfloat16

    def layer_norm(v, g, b):
        # single-pass stats; padded channels are exactly 0 so they drop out of
        # both sums; divide by the *real* channel count; clamp the variance to
        # guard against E[x^2]-E[x]^2 cancellation.
        mu = jnp.sum(v, axis=-1, keepdims=True) * inv_c
        ex2 = jnp.sum(v * v, axis=-1, keepdims=True) * inv_c
        var = jnp.maximum(ex2 - mu * mu, 0.0)
        return (v - mu) * lax.rsqrt(var + LN_EPS) * g + b

    ln1g = ln1g_ref[...]
    ln1b = ln1b_ref[...]
    w1a = w1a_ref[...]          # (Tp, Lp) bf16 == cumsum(W1, axis=1) (causal fold)
    b1 = b1_ref[...]            # (Tp, Cp) f32, padded channel columns zeroed
    w2 = w2_ref[...]            # (Lp, Tp) bf16
    b2 = b2_ref[...]            # (Lp, Cp) f32, padded channel columns zeroed

    # ---- token LayerNorm + token-mixing MLP, one batch element / iteration ----
    # x1 = x + mask * token_mix(LN1(x)) is staged directly into out_ref.
    # TODO(synk): fuse the bb dots into one (Tp,Lp)@(Lp,bb*Cp) matmul (needs a
    # seq-major relayout of y through the XLU) to raise MXU occupancy when
    # Lp << 256 on the 256-wide v6e/v7x MXUs.
    def token_body(b, carry):
        r0 = pl.multiple_of(b * lp, 8)
        xb = x_ref[pl.ds(r0, lp), :].astype(f32)            # (Lp, Cp)
        mb = mask_ref[pl.ds(r0, lp), :]                     # (Lp, 1)
        yb = layer_norm(xb, ln1g, ln1b).astype(bf16)
        h = jnp.dot(w1a, yb, preferred_element_type=f32) + b1
        h = _gelu(h).astype(bf16)
        o = jnp.dot(w2, h, preferred_element_type=f32) + b2   # (Lp, Cp)
        out_ref[pl.ds(r0, lp), :] = (xb + o * mb).astype(out_ref.dtype)
        return carry

    lax.fori_loop(0, bb, token_body, 0, unroll=min(bb, 4))

    # ---- channel LayerNorm + channel-mixing MLP over the whole (R, Cp) slab ----
    x1 = out_ref[...].astype(f32)                           # (R, Cp)
    mask = mask_ref[...]                                    # (R, 1)
    y2 = layer_norm(x1, ln2g_ref[...], ln2b_ref[...]).astype(bf16)

    hp = wc1_ref.shape[1]
    nhc = hp // hc
    if nhc == 1:
        h2 = _gelu(jnp.dot(y2, wc1_ref[...], preferred_element_type=f32)
                   + bc1_ref[...])
        ych = jnp.dot(h2.astype(bf16), wc2_ref[...], preferred_element_type=f32)
    else:
        # hidden dim blocked so no (R, Hp) slab is ever live (v7x: 64 MiB/TC).
        def chan_body(j, acc):
            c0 = pl.multiple_of(j * hc, 128)
            hj = jnp.dot(y2, wc1_ref[:, pl.ds(c0, hc)],
                         preferred_element_type=f32) + bc1_ref[:, pl.ds(c0, hc)]
            hj = _gelu(hj).astype(bf16)
            return acc + jnp.dot(hj, wc2_ref[pl.ds(c0, hc), :],
                                 preferred_element_type=f32)

        ych = lax.fori_loop(0, nhc, chan_body, jnp.zeros_like(x1),
                            unroll=min(nhc, 2))

    out_ref[...] = (x1 + (ych + bc2_ref[...]) * mask).astype(out_ref.dtype)


# --------------------------- parameter preparation ---------------------------
def prepare_params(p, L, C, T, H):
    """Fold / transpose / pad / cast torch-layout params for the kernel."""
    Lp, Tp = _round_up(L, 8), _round_up(T, 8)
    Cp, Hp = _round_up(C, 128), _round_up(H, 128)
    f32, bf16 = jnp.float32, jnp.bfloat16
    # causal suffix-sum folded into token fc1: W1 @ A == cumsum(W1, axis=1).
    # NOTE: accumulated in f32, rounded once to bf16 (relative error stays at
    # bf16 eps of the summed weight).
    w1a = jnp.cumsum(p["w1"].astype(f32), axis=1)
    # token-mix biases pre-broadcast over channels with padded columns zeroed,
    # so no explicit channel-pad mask multiply is needed in the kernel.
    b1_cp = jnp.broadcast_to(p["b1"].astype(f32)[:, None], (T, C))
    b2_cp = jnp.broadcast_to(p["b2"].astype(f32)[:, None], (L, C))
    prep = dict(
        ln1_g=_pad_to(p["ln1_g"].reshape(1, C).astype(f32), (1, Cp)),
        ln1_b=_pad_to(p["ln1_b"].reshape(1, C).astype(f32), (1, Cp)),
        ln2_g=_pad_to(p["ln2_g"].reshape(1, C).astype(f32), (1, Cp)),
        ln2_b=_pad_to(p["ln2_b"].reshape(1, C).astype(f32), (1, Cp)),
        w1a=_pad_to(w1a, (Tp, Lp)).astype(bf16),     # pad AFTER cumsum -> zero cols
        b1=_pad_to(b1_cp, (Tp, Cp)),
        w2=_pad_to(p["w2"].astype(f32), (Lp, Tp)).astype(bf16),
        b2=_pad_to(b2_cp, (Lp, Cp)),
        wc1t=_pad_to(p["wc1"].T.astype(f32), (Cp, Hp)).astype(bf16),
        bc1=_pad_to(p["bc1"].reshape(1, H).astype(f32), (1, Hp)),
        wc2t=_pad_to(p["wc2"].T.astype(f32), (Hp, Cp)).astype(bf16),
        bc2=_pad_to(p["bc2"].reshape(1, C).astype(f32), (1, Cp)),
    )
    return prep, (Lp, Cp, Tp, Hp)


def _pad_or_truncate(x, attention_mask, max_seq_length):
    """Mirror the torch module's sequence padding / truncation (and mask creation)."""
    B, S, C = x.shape
    L = max_seq_length
    if S < L:
        x = jnp.concatenate([x, jnp.zeros((B, L - S, C), x.dtype)], axis=1)
        if attention_mask is None:
            attention_mask = jnp.ones((B, S), x.dtype)
        attention_mask = jnp.concatenate(
            [attention_mask, jnp.zeros((B, L - S), attention_mask.dtype)], axis=1)
    elif S > L:
        x = x[:, :L, :]
        if attention_mask is not None:
            attention_mask = attention_mask[:, :L]
    return x, attention_mask


# ------------------------------ sizing helpers ------------------------------
def _vmem_capacity_bytes():
    try:
        return int(pltpu.get_tpu_info().vmem_capacity_bytes)
    except Exception:
        return 128 * 2**20          # v5e / v6e default; conservative fallback


def _tensorcores_per_chip():
    try:
        d = jax.devices()[0]
        for attr in ("num_cores", "core_count", "num_tensorcores"):
            n = getattr(d, attr, None)
            if isinstance(n, int) and n > 0:
                return n
    except Exception:
        pass
    return 1


def _hidden_chunk(Hp):
    if Hp <= 512:
        return Hp
    for hc in (512, 384, 256, 128):
        if Hp % hc == 0:
            return hc
    return 128


def _resident_spec(a):
    """Whole array resident in VMEM, single-buffered (constant index_map)."""
    try:
        return pl.BlockSpec(a.shape, lambda i: (0, 0),
                            pipeline_mode=pl.Buffered(1))
    except TypeError:               # older jax without pipeline_mode kwarg
        return pl.BlockSpec(a.shape, lambda i: (0, 0))


# ------------------------------ wrapper / glue ------------------------------
def mlp_mixer_forward(x, params, max_seq_length, attention_mask=None,
                      io_dtype=jnp.bfloat16):
    orig_dtype = x.dtype
    x, attention_mask = _pad_or_truncate(x, attention_mask, max_seq_length)
    B, L, C = x.shape
    T, H = params["w1"].shape[0], params["wc1"].shape[0]
    prep, (Lp, Cp, Tp, Hp) = prepare_params(params, L, C, T, H)

    # multiplying by ones == "no mask applied" in the torch module
    eff = (jnp.ones((B, L), jnp.float32) if attention_mask is None
           else attention_mask.astype(jnp.float32))

    hc = _hidden_chunk(Hp)
    io_bytes = jnp.dtype(io_dtype).itemsize
    weight_bytes = sum(int(a.size) * a.dtype.itemsize for a in prep.values())

    vmem_cap = _vmem_capacity_bytes()
    budget = int(min(vmem_cap - (16 << 20), vmem_cap * 0.8))

    def vmem_estimate(bb):
        R = bb * Lp
        est = weight_bytes                            # Buffered(1) resident weights
        est += 2 * (R * Cp * io_bytes + R * 4)        # double-buffered x tile + mask
        est += 2 * (R * Cp * io_bytes)                # double-buffered out tile
        est += R * Cp * (4 + 2 + 4)                   # x1 f32 + y2 bf16 + ych f32 acc
        est += R * hc * (4 + 2)                       # h2 chunk f32 + bf16
        est += 4 * (Lp * Cp * 12 + Tp * Cp * 6)       # token-loop temporaries (x4 unroll)
        est += 4 << 20                                # slack
        return est

    # ---- tiling: target ~1024 rows / step, shrink until it fits VMEM ----
    Bb = max(1, min(B, max(1, 1024 // Lp)))
    ncores = _tensorcores_per_chip()
    if ncores > 1 and B > 1 and _cdiv(B, Bb) < ncores:
        Bb = max(1, _cdiv(B, ncores))     # keep every TensorCore busy (v7x)
    while Bb > 1 and vmem_estimate(Bb) > budget:
        Bb = max(1, Bb // 2)
    G = _cdiv(B, Bb)
    Bpad = G * Bb
    R = Bb * Lp                           # rows per grid step; lane-dense (R, Cp)
    vmem_limit = int(max(budget, 32 << 20))

    # pad (batch, seq, chan) and flatten rows=(batch, seq) into lane-dense slabs
    x_p = jnp.zeros((Bpad, Lp, Cp), io_dtype).at[:B, :L, :C].set(x.astype(io_dtype))
    m_p = jnp.zeros((Bpad, Lp, 1), jnp.float32).at[:B, :L, 0].set(eff)
    x2 = x_p.reshape(Bpad * Lp, Cp)
    m2 = m_p.reshape(Bpad * Lp, 1)

    weight_order = ("ln1_g", "ln1_b", "w1a", "b1", "w2", "b2",
                    "ln2_g", "ln2_b", "wc1t", "bc1", "wc2t", "bc2")
    in_specs = [pl.BlockSpec((R, Cp), lambda i: (i, 0)),   # activations (per block)
                pl.BlockSpec((R, 1), lambda i: (i, 0))]    # row (attention) mask
    in_specs += [_resident_spec(prep[k]) for k in weight_order]

    kernel = functools.partial(mixer_kernel, lp=Lp, bb=Bb, hc=hc, inv_c=1.0 / C)
    out2 = pl.pallas_call(
        kernel,
        out_shape=jax.ShapeDtypeStruct((Bpad * Lp, Cp), io_dtype),
        grid_spec=pltpu.PrefetchScalarGridSpec(
            num_scalar_prefetch=0,
            grid=(G,),
            in_specs=in_specs,
            out_specs=pl.BlockSpec((R, Cp), lambda i: (i, 0)),
        ),
        compiler_params=pltpu.CompilerParams(
            dimension_semantics=("parallel",),
            vmem_limit_bytes=vmem_limit,
        ),
    )(x2, m2, *[prep[k] for k in weight_order])

    out = out2.reshape(Bpad, Lp, Cp)[:B, :L, :C].astype(orig_dtype)
    return out, attention_mask


# ------------------------------ params init ------------------------------
def init_params(key, L, C, T, H):
    ks = jax.random.split(key, 8)

    def lin(k, out_dim, in_dim):   # torch nn.Linear default init
        bound = 1.0 / jnp.sqrt(jnp.float32(in_dim))
        kw, kb = jax.random.split(k)
        w = jax.random.uniform(kw, (out_dim, in_dim), jnp.float32, -bound, bound)
        b = jax.random.uniform(kb, (out_dim,), jnp.float32, -bound, bound)
        return w, b

    w1, b1 = lin(ks[0], T, L)      # token_mix.fc1 : Linear(L -> T)
    w2, b2 = lin(ks[1], L, T)      # token_mix.fc2 : Linear(T -> L)
    wc1, bc1 = lin(ks[2], H, C)    # channel_mix.fc1 : Linear(C -> H)
    wc2, bc2 = lin(ks[3], C, H)    # channel_mix.fc2 : Linear(H -> C)
    return dict(
        w1=w1, b1=b1, w2=w2, b2=b2, wc1=wc1, bc1=bc1, wc2=wc2, bc2=bc2,
        ln1_g=(1.0 + 0.1 * jax.random.normal(ks[4], (C,))).astype(jnp.float32),
        ln1_b=(0.1 * jax.random.normal(ks[5], (C,))).astype(jnp.float32),
        ln2_g=(1.0 + 0.1 * jax.random.normal(ks[6], (C,))).astype(jnp.float32),
        ln2_b=(0.1 * jax.random.normal(ks[7], (C,))).astype(jnp.float32),
    )


# ------------------------------ pure-JAX references ------------------------------
def ref_forward_f32(x, p, max_seq_length, attention_mask=None):
    """Exact f32 mirror of the torch module (semantics reference)."""
    x, attention_mask = _pad_or_truncate(x, attention_mask, max_seq_length)
    B, L, C = x.shape

    def ln(v, g, b):
        mu = jnp.mean(v, -1, keepdims=True)
        var = jnp.mean((v - mu) ** 2, -1, keepdims=True)
        return (v - mu) * lax.rsqrt(var + LN_EPS) * g + b

    y = ln(x, p["ln1_g"], p["ln1_b"])
    yT = jnp.swapaxes(y, 1, 2)                              # (B, C, L)
    M = 1.0 - jnp.triu(jnp.ones((L, L), x.dtype), k=1)      # (~causal_mask)
    yT = yT @ M
    h = _gelu(yT @ p["w1"].T + p["b1"])
    yT = h @ p["w2"].T + p["b2"]
    y = jnp.swapaxes(yT, 1, 2)
    m = None
    if attention_mask is not None:
        m = attention_mask[..., None].astype(x.dtype)
        y = y * m
    x = x + y
    y = ln(x, p["ln2_g"], p["ln2_b"])
    h = _gelu(y @ p["wc1"].T + p["bc1"])
    y = h @ p["wc2"].T + p["bc2"]
    if attention_mask is not None:
        y = y * m
    return x + y, attention_mask


def ref_forward_matched(x, p, max_seq_length, attention_mask=None,
                        io_dtype=jnp.bfloat16):
    """Pure-JAX reference using the same folded/padded/bf16-I/O math as the kernel."""
    x, attention_mask = _pad_or_truncate(x, attention_mask, max_seq_length)
    B, L, C = x.shape
    T, H = p["w1"].shape[0], p["wc1"].shape[0]
    prep, (Lp, Cp, _, _) = prepare_params(p, L, C, T, H)
    eff = (jnp.ones((B, L), jnp.float32) if attention_mask is None
           else attention_mask.astype(jnp.float32))
    x_p = jnp.zeros((B, Lp, Cp), io_dtype).at[:, :L, :C].set(x.astype(io_dtype))
    x_p = x_p.astype(jnp.float32)
    m_p = jnp.zeros((B, Lp, 1), jnp.float32).at[:, :L, 0].set(eff)
    inv_c = 1.0 / C

    def ln(v, g, b):
        mu = jnp.sum(v, -1, keepdims=True) * inv_c
        ex2 = jnp.sum(v * v, -1, keepdims=True) * inv_c
        var = jnp.maximum(ex2 - mu * mu, 0.0)
        return (v - mu) * lax.rsqrt(var + LN_EPS) * g + b

    y = ln(x_p, prep["ln1_g"], prep["ln1_b"]).astype(jnp.bfloat16)
    h = jnp.einsum("tl,blc->btc", prep["w1a"], y,
                   preferred_element_type=jnp.float32) + prep["b1"]
    h = _gelu(h).astype(jnp.bfloat16)
    ymix = jnp.einsum("lt,btc->blc", prep["w2"], h,
                      preferred_element_type=jnp.float32) + prep["b2"]
    x1 = (x_p + ymix * m_p).astype(io_dtype).astype(jnp.float32)
    y2 = ln(x1, prep["ln2_g"], prep["ln2_b"]).astype(jnp.bfloat16)
    h2 = jnp.einsum("blc,ch->blh", y2, prep["wc1t"],
                    preferred_element_type=jnp.float32) + prep["bc1"]
    h2 = _gelu(h2).astype(jnp.bfloat16)
    ych = jnp.einsum("blh,hc->blc", h2, prep["wc2t"],
                     preferred_element_type=jnp.float32) + prep["bc2"]
    out = (x1 + ych * m_p).astype(io_dtype).astype(jnp.float32)
    return out[:, :L, :C], attention_mask


if __name__ == "__main__":
    key = jax.random.PRNGKey(0)
    B, S, C = 2, 6, 16          # seq (6) < max_seq_length (8) exercises padding path
    L, T, MULT = 8, 32, 4       # max_seq_length, token_dim, channel_dim_multiplier
    H = C * MULT

    kx, kp = jax.random.split(key)
    x = jax.random.normal(kx, (B, S, C), dtype=jnp.float32)
    params = init_params(kp, L, C, T, H)

    out, attn_mask = mlp_mixer_forward(x, params, L, attention_mask=None)
    out = jax.block_until_ready(out)
    assert out.shape == (B, L, C)
    assert attn_mask is not None and attn_mask.shape == (B, L)

    # tight check vs a pure-JAX reference using identical (bf16 I/O + matmul) math
    ref_m, _ = ref_forward_matched(x, params, L, attention_mask=None)
    assert jnp.allclose(out, ref_m, atol=2e-2, rtol=2e-2), \
        "mismatch vs matched-precision reference"

    # loose sanity check vs the exact-f32 torch-semantics reference
    # (bf16 activation I/O + bf16 matmul operands give ~1e-2-scale abs diffs)
    ref_f, ref_mask = ref_forward_f32(x, params, L, attention_mask=None)
    assert float(jnp.max(jnp.abs(out - ref_f))) < 0.5, "too far from f32 reference"
    assert jnp.allclose(attn_mask, ref_mask), "mask mismatch vs reference"
    print("KERNEL_OK")
</pallas_src>

<mosaic_0001>
module attributes {stable_mosaic.version = 11 : i64} {
  func.func @mixer_kernel(%arg0: i32, %arg1: memref<16x128xbf16, #tpu.memory_space<vmem>>, %arg2: memref<16x1xf32, #tpu.memory_space<vmem>>, %arg3: memref<1x128xf32, #tpu.memory_space<vmem>>, %arg4: memref<1x128xf32, #tpu.memory_space<vmem>>, %arg5: memref<32x8xbf16, #tpu.memory_space<vmem>>, %arg6: memref<32x128xf32, #tpu.memory_space<vmem>>, %arg7: memref<8x32xbf16, #tpu.memory_space<vmem>>, %arg8: memref<8x128xf32, #tpu.memory_space<vmem>>, %arg9: memref<1x128xf32, #tpu.memory_space<vmem>>, %arg10: memref<1x128xf32, #tpu.memory_space<vmem>>, %arg11: memref<128x128xbf16, #tpu.memory_space<vmem>>, %arg12: memref<1x128xf32, #tpu.memory_space<vmem>>, %arg13: memref<128x128xbf16, #tpu.memory_space<vmem>>, %arg14: memref<1x128xf32, #tpu.memory_space<vmem>>, %arg15: memref<16x128xbf16, #tpu.memory_space<vmem>>) attributes {dimension_semantics = [#tpu.dimension_semantics<parallel>], iteration_bounds = array<i64: 1>, scalar_prefetch = 0 : i64, scratch_operands = 0 : i64, tpu.core_type = #tpu.core_type<tc>, window_params = [{transform_indices = @transform_0, window_bounds = array<i64: 16, 128>}, {transform_indices = @transform_1, window_bounds = array<i64: 16, 1>}, {pipeline_mode = #tpu.pipeline_mode<synchronous>, transform_indices = @transform_2, window_bounds = array<i64: 1, 128>}, {pipeline_mode = #tpu.pipeline_mode<synchronous>, transform_indices = @transform_3, window_bounds = array<i64: 1, 128>}, {pipeline_mode = #tpu.pipeline_mode<synchronous>, transform_indices = @transform_4, window_bounds = array<i64: 32, 8>}, {pipeline_mode = #tpu.pipeline_mode<synchronous>, transform_indices = @transform_5, window_bounds = array<i64: 32, 128>}, {pipeline_mode = #tpu.pipeline_mode<synchronous>, transform_indices = @transform_6, window_bounds = array<i64: 8, 32>}, {pipeline_mode = #tpu.pipeline_mode<synchronous>, transform_indices = @transform_7, window_bounds = array<i64: 8, 128>}, {pipeline_mode = #tpu.pipeline_mode<synchronous>, transform_indices = @transform_8, window_bounds = array<i64: 1, 128>}, {pipeline_mode = #tpu.pipeline_mode<synchronous>, transform_indices = @transform_9, window_bounds = array<i64: 1, 128>}, {pipeline_mode = #tpu.pipeline_mode<synchronous>, transform_indices = @transform_10, window_bounds = array<i64: 128, 128>}, {pipeline_mode = #tpu.pipeline_mode<synchronous>, transform_indices = @transform_11, window_bounds = array<i64: 1, 128>}, {pipeline_mode = #tpu.pipeline_mode<synchronous>, transform_indices = @transform_12, window_bounds = array<i64: 128, 128>}, {pipeline_mode = #tpu.pipeline_mode<synchronous>, transform_indices = @transform_13, window_bounds = array<i64: 1, 128>}, {transform_indices = @transform_14, window_bounds = array<i64: 16, 128>}]} {
    %c0 = arith.constant 0 : index
    %c0_0 = arith.constant 0 : index
    %0 = vector.load %arg3[%c0, %c0_0] : memref<1x128xf32, #tpu.memory_space<vmem>>, vector<1x128xf32>
    %c0_1 = arith.constant 0 : index
    %c0_2 = arith.constant 0 : index
    %1 = vector.load %arg4[%c0_1, %c0_2] : memref<1x128xf32, #tpu.memory_space<vmem>>, vector<1x128xf32>
    %c0_3 = arith.constant 0 : index
    %c0_4 = arith.constant 0 : index
    %2 = vector.load %arg5[%c0_3, %c0_4] : memref<32x8xbf16, #tpu.memory_space<vmem>>, vector<32x8xbf16>
    %c0_5 = arith.constant 0 : index
    %c0_6 = arith.constant 0 : index
    %3 = vector.load %arg6[%c0_5, %c0_6] : memref<32x128xf32, #tpu.memory_space<vmem>>, vector<32x128xf32>
    %c0_7 = arith.constant 0 : index
    %c0_8 = arith.constant 0 : index
    %4 = vector.load %arg7[%c0_7, %c0_8] : memref<8x32xbf16, #tpu.memory_space<vmem>>, vector<8x32xbf16>
    %c0_9 = arith.constant 0 : index
    %c0_10 = arith.constant 0 : index
    %5 = vector.load %arg8[%c0_9, %c0_10] : memref<8x128xf32, #tpu.memory_space<vmem>>, vector<8x128xf32>
    %c0_i32 = arith.constant 0 : i32
    %c8_i32 = arith.constant 8 : i32
    %6 = arith.muli %c0_i32, %c8_i32 : i32
    %7 = tpu.assume_multiple %6, 8 : i32
    %8 = arith.index_cast %7 : i32 to index
    %c0_11 = arith.constant 0 : index
    %9 = vector.load %arg1[%8, %c0_11] : memref<16x128xbf16, #tpu.memory_space<vmem>>, vector<8x128xbf16>
    %10 = arith.extf %9 : vector<8x128xbf16> to vector<8x128xf32>
    %11 = arith.index_cast %7 : i32 to index
    %c0_12 = arith.constant 0 : index
    %12 = vector.load %arg2[%11, %c0_12] : memref<16x1xf32, #tpu.memory_space<vmem>>, vector<8x1xf32>
    %cst = arith.constant dense<0.000000e+00> : vector<8xf32>
    %13 = vector.multi_reduction <add>, %10, %cst [1] : vector<8x128xf32> to vector<8xf32>
    %14 = vector.shape_cast %13 : vector<8xf32> to vector<8x1xf32>
    %cst_13 = arith.constant 6.250000e-02 : f32
    %15 = vector.broadcast %cst_13 : f32 to vector<8x1xf32>
    %16 = arith.mulf %14, %15 : vector<8x1xf32>
    %17 = arith.mulf %10, %10 : vector<8x128xf32>
    %cst_14 = arith.constant dense<0.000000e+00> : vector<8xf32>
    %18 = vector.multi_reduction <add>, %17, %cst_14 [1] : vector<8x128xf32> to vector<8xf32>
    %19 = vector.shape_cast %18 : vector<8xf32> to vector<8x1xf32>
    %cst_15 = arith.constant 6.250000e-02 : f32
    %20 = vector.broadcast %cst_15 : f32 to vector<8x1xf32>
    %21 = arith.mulf %19, %20 : vector<8x1xf32>
    %22 = arith.mulf %16, %16 : vector<8x1xf32>
    %23 = arith.subf %21, %22 : vector<8x1xf32>
    %cst_16 = arith.constant 0.000000e+00 : f32
    %24 = vector.broadcast %cst_16 : f32 to vector<8x1xf32>
    %25 = arith.maximumf %23, %24 : vector<8x1xf32>
    %26 = vector.broadcast %16 : vector<8x1xf32> to vector<8x128xf32>
    %27 = arith.subf %10, %26 : vector<8x128xf32>
    %cst_17 = arith.constant 9.99999974E-6 : f32
    %28 = vector.broadcast %cst_17 : f32 to vector<8x1xf32>
    %29 = arith.addf %25, %28 : vector<8x1xf32>
    %30 = math.rsqrt %29 : vector<8x1xf32>
    %31 = vector.broadcast %30 : vector<8x1xf32> to vector<8x128xf32>
    %32 = arith.mulf %27, %31 : vector<8x128xf32>
    %33 = vector.broadcast %0 : vector<1x128xf32> to vector<8x128xf32>
    %34 = arith.mulf %32, %33 : vector<8x128xf32>
    %35 = vector.broadcast %1 : vector<1x128xf32> to vector<8x128xf32>
    %36 = arith.addf %34, %35 : vector<8x128xf32>
    %37 = arith.truncf %36 : vector<8x128xf32> to vector<8x128xbf16>
    %cst_18 = arith.constant dense<0.000000e+00> : vector<32x128xf32>
    %38 = tpu.matmul %2, %37, %cst_18 {dimension_numbers = #tpu.dot_dimension_numbers<[1], [0], [0], [1], [0, 0, 1, 1], [], []>} : vector<32x8xbf16>, vector<8x128xbf16>, vector<32x128xf32> -> vector<32x128xf32>
    %39 = arith.addf %38, %3 : vector<32x128xf32>
    %cst_19 = arith.constant 5.000000e-01 : f32
    %40 = vector.broadcast %cst_19 : f32 to vector<32x128xf32>
    %41 = arith.mulf %40, %39 : vector<32x128xf32>
    %cst_20 = arith.constant 0.707106769 : f32
    %42 = vector.broadcast %cst_20 : f32 to vector<32x128xf32>
    %43 = arith.mulf %39, %42 : vector<32x128xf32>
    %44 = math.erf %43 : vector<32x128xf32>
    %cst_21 = arith.constant 1.000000e+00 : f32
    %45 = vector.broadcast %cst_21 : f32 to vector<32x128xf32>
    %46 = arith.addf %45, %44 : vector<32x128xf32>
    %47 = arith.mulf %41, %46 : vector<32x128xf32>
    %48 = arith.truncf %47 : vector<32x128xf32> to vector<32x128xbf16>
    %cst_22 = arith.constant dense<0.000000e+00> : vector<8x128xf32>
    %49 = tpu.matmul %4, %48, %cst_22 {dimension_numbers = #tpu.dot_dimension_numbers<[1], [0], [0], [1], [0, 0, 1, 1], [], []>} : vector<8x32xbf16>, vector<32x128xbf16>, vector<8x128xf32> -> vector<8x128xf32>
    %50 = arith.addf %49, %5 : vector<8x128xf32>
    %51 = vector.broadcast %12 : vector<8x1xf32> to vector<8x128xf32>
    %52 = arith.mulf %50, %51 : vector<8x128xf32>
    %53 = arith.addf %10, %52 : vector<8x128xf32>
    %54 = arith.truncf %53 : vector<8x128xf32> to vector<8x128xbf16>
    %55 = arith.index_cast %7 : i32 to index
    %c0_23 = arith.constant 0 : index
    %56 = vector.load %arg15[%55, %c0_23] : memref<16x128xbf16, #tpu.memory_space<vmem>>, vector<8x128xbf16>
    tpu.vector_store %arg15[%55, %c0_23], %54 {strides = array<i32>} : memref<16x128xbf16, #tpu.memory_space<vmem>>, vector<8x128xbf16>,
    %c1_i32 = arith.constant 1 : i32
    %c8_i32_24 = arith.constant 8 : i32
    %57 = arith.muli %c1_i32, %c8_i32_24 : i32
    %58 = tpu.assume_multiple %57, 8 : i32
    %59 = arith.index_cast %58 : i32 to index
    %c0_25 = arith.constant 0 : index
    %60 = vector.load %arg1[%59, %c0_25] : memref<16x128xbf16, #tpu.memory_space<vmem>>, vector<8x128xbf16>
    %61 = arith.extf %60 : vector<8x128xbf16> to vector<8x128xf32>
    %62 = arith.index_cast %58 : i32 to index
    %c0_26 = arith.constant 0 : index
    %63 = vector.load %arg2[%62, %c0_26] : memref<16x1xf32, #tpu.memory_space<vmem>>, vector<8x1xf32>
    %cst_27 = arith.constant dense<0.000000e+00> : vector<8xf32>
    %64 = vector.multi_reduction <add>, %61, %cst_27 [1] : vector<8x128xf32> to vector<8xf32>
    %65 = vector.shape_cast %64 : vector<8xf32> to vector<8x1xf32>
    %cst_28 = arith.constant 6.250000e-02 : f32
    %66 = vector.broadcast %cst_28 : f32 to vector<8x1xf32>
    %67 = arith.mulf %65, %66 : vector<8x1xf32>
    %68 = arith.mulf %61, %61 : vector<8x128xf32>
    %cst_29 = arith.constant dense<0.000000e+00> : vector<8xf32>
    %69 = vector.multi_reduction <add>, %68, %cst_29 [1] : vector<8x128xf32> to vector<8xf32>
    %70 = vector.shape_cast %69 : vector<8xf32> to vector<8x1xf32>
    %cst_30 = arith.constant 6.250000e-02 : f32
    %71 = vector.broadcast %cst_30 : f32 to vector<8x1xf32>
    %72 = arith.mulf %70, %71 : vector<8x1xf32>
    %73 = arith.mulf %67, %67 : vector<8x1xf32>
    %74 = arith.subf %72, %73 : vector<8x1xf32>
    %cst_31 = arith.constant 0.000000e+00 : f32
    %75 = vector.broadcast %cst_31 : f32 to vector<8x1xf32>
    %76 = arith.maximumf %74, %75 : vector<8x1xf32>
    %77 = vector.broadcast %67 : vector<8x1xf32> to vector<8x128xf32>
    %78 = arith.subf %61, %77 : vector<8x128xf32>
    %cst_32 = arith.constant 9.99999974E-6 : f32
    %79 = vector.broadcast %cst_32 : f32 to vector<8x1xf32>
    %80 = arith.addf %76, %79 : vector<8x1xf32>
    %81 = math.rsqrt %80 : vector<8x1xf32>
    %82 = vector.broadcast %81 : vector<8x1xf32> to vector<8x128xf32>
    %83 = arith.mulf %78, %82 : vector<8x128xf32>
    %84 = vector.broadcast %0 : vector<1x128xf32> to vector<8x128xf32>
    %85 = arith.mulf %83, %84 : vector<8x128xf32>
    %86 = vector.broadcast %1 : vector<1x128xf32> to vector<8x128xf32>
    %87 = arith.addf %85, %86 : vector<8x128xf32>
    %88 = arith.truncf %87 : vector<8x128xf32> to vector<8x128xbf16>
    %cst_33 = arith.constant dense<0.000000e+00> : vector<32x128xf32>
    %89 = tpu.matmul %2, %88, %cst_33 {dimension_numbers = #tpu.dot_dimension_numbers<[1], [0], [0], [1], [0, 0, 1, 1], [], []>} : vector<32x8xbf16>, vector<8x128xbf16>, vector<32x128xf32> -> vector<32x128xf32>
    %90 = arith.addf %89, %3 : vector<32x128xf32>
    %cst_34 = arith.constant 5.000000e-01 : f32
    %91 = vector.broadcast %cst_34 : f32 to vector<32x128xf32>
    %92 = arith.mulf %91, %90 : vector<32x128xf32>
    %cst_35 = arith.constant 0.707106769 : f32
    %93 = vector.broadcast %cst_35 : f32 to vector<32x128xf32>
    %94 = arith.mulf %90, %93 : vector<32x128xf32>
    %95 = math.erf %94 : vector<32x128xf32>
    %cst_36 = arith.constant 1.000000e+00 : f32
    %96 = vector.broadcast %cst_36 : f32 to vector<32x128xf32>
    %97 = arith.addf %96, %95 : vector<32x128xf32>
    %98 = arith.mulf %92, %97 : vector<32x128xf32>
    %99 = arith.truncf %98 : vector<32x128xf32> to vector<32x128xbf16>
    %cst_37 = arith.constant dense<0.000000e+00> : vector<8x128xf32>
    %100 = tpu.matmul %4, %99, %cst_37 {dimension_numbers = #tpu.dot_dimension_numbers<[1], [0], [0], [1], [0, 0, 1, 1], [], []>} : vector<8x32xbf16>, vector<32x128xbf16>, vector<8x128xf32> -> vector<8x128xf32>
    %101 = arith.addf %100, %5 : vector<8x128xf32>
    %102 = vector.broadcast %63 : vector<8x1xf32> to vector<8x128xf32>
    %103 = arith.mulf %101, %102 : vector<8x128xf32>
    %104 = arith.addf %61, %103 : vector<8x128xf32>
    %105 = arith.truncf %104 : vector<8x128xf32> to vector<8x128xbf16>
    %106 = arith.index_cast %58 : i32 to index
    %c0_38 = arith.constant 0 : index
    %107 = vector.load %arg15[%106, %c0_38] : memref<16x128xbf16, #tpu.memory_space<vmem>>, vector<8x128xbf16>
    tpu.vector_store %arg15[%106, %c0_38], %105 {strides = array<i32>} : memref<16x128xbf16, #tpu.memory_space<vmem>>, vector<8x128xbf16>,
    %c2_i32 = arith.constant 2 : i32
    %c0_39 = arith.constant 0 : index
    %c0_40 = arith.constant 0 : index
    %108 = vector.load %arg15[%c0_39, %c0_40] : memref<16x128xbf16, #tpu.memory_space<vmem>>, vector<16x128xbf16>
    %109 = arith.extf %108 : vector<16x128xbf16> to vector<16x128xf32>
    %c0_41 = arith.constant 0 : index
    %c0_42 = arith.constant 0 : index
    %110 = vector.load %arg2[%c0_41, %c0_42] : memref<16x1xf32, #tpu.memory_space<vmem>>, vector<16x1xf32>
    %c0_43 = arith.constant 0 : index
    %c0_44 = arith.constant 0 : index
    %111 = vector.load %arg9[%c0_43, %c0_44] : memref<1x128xf32, #tpu.memory_space<vmem>>, vector<1x128xf32>
    %c0_45 = arith.constant 0 : index
    %c0_46 = arith.constant 0 : index
    %112 = vector.load %arg10[%c0_45, %c0_46] : memref<1x128xf32, #tpu.memory_space<vmem>>, vector<1x128xf32>
    %cst_47 = arith.constant dense<0.000000e+00> : vector<16xf32>
    %113 = vector.multi_reduction <add>, %109, %cst_47 [1] : vector<16x128xf32> to vector<16xf32>
    %114 = vector.shape_cast %113 : vector<16xf32> to vector<16x1xf32>
    %cst_48 = arith.constant 6.250000e-02 : f32
    %115 = vector.broadcast %cst_48 : f32 to vector<16x1xf32>
    %116 = arith.mulf %114, %115 : vector<16x1xf32>
    %117 = arith.mulf %109, %109 : vector<16x128xf32>
    %cst_49 = arith.constant dense<0.000000e+00> : vector<16xf32>
    %118 = vector.multi_reduction <add>, %117, %cst_49 [1] : vector<16x128xf32> to vector<16xf32>
    %119 = vector.shape_cast %118 : vector<16xf32> to vector<16x1xf32>
    %cst_50 = arith.constant 6.250000e-02 : f32
    %120 = vector.broadcast %cst_50 : f32 to vector<16x1xf32>
    %121 = arith.mulf %119, %120 : vector<16x1xf32>
    %122 = arith.mulf %116, %116 : vector<16x1xf32>
    %123 = arith.subf %121, %122 : vector<16x1xf32>
    %cst_51 = arith.constant 0.000000e+00 : f32
    %124 = vector.broadcast %cst_51 : f32 to vector<16x1xf32>
    %125 = arith.maximumf %123, %124 : vector<16x1xf32>
    %126 = vector.broadcast %116 : vector<16x1xf32> to vector<16x128xf32>
    %127 = arith.subf %109, %126 : vector<16x128xf32>
    %cst_52 = arith.constant 9.99999974E-6 : f32
    %128 = vector.broadcast %cst_52 : f32 to vector<16x1xf32>
    %129 = arith.addf %125, %128 : vector<16x1xf32>
    %130 = math.rsqrt %129 : vector<16x1xf32>
    %131 = vector.broadcast %130 : vector<16x1xf32> to vector<16x128xf32>
    %132 = arith.mulf %127, %131 : vector<16x128xf32>
    %133 = vector.broadcast %111 : vector<1x128xf32> to vector<16x128xf32>
    %134 = arith.mulf %132, %133 : vector<16x128xf32>
    %135 = vector.broadcast %112 : vector<1x128xf32> to vector<16x128xf32>
    %136 = arith.addf %134, %135 : vector<16x128xf32>
    %137 = arith.truncf %136 : vector<16x128xf32> to vector<16x128xbf16>
    %c0_53 = arith.constant 0 : index
    %c0_54 = arith.constant 0 : index
    %138 = vector.load %arg11[%c0_53, %c0_54] : memref<128x128xbf16, #tpu.memory_space<vmem>>, vector<128x128xbf16>
    %cst_55 = arith.constant dense<0.000000e+00> : vector<16x128xf32>
    %139 = tpu.matmul %137, %138, %cst_55 {dimension_numbers = #tpu.dot_dimension_numbers<[1], [0], [0], [1], [0, 0, 1, 1], [], []>} : vector<16x128xbf16>, vector<128x128xbf16>, vector<16x128xf32> -> vector<16x128xf32>
    %c0_56 = arith.constant 0 : index
    %c0_57 = arith.constant 0 : index
    %140 = vector.load %arg12[%c0_56, %c0_57] : memref<1x128xf32, #tpu.memory_space<vmem>>, vector<1x128xf32>
    %141 = vector.broadcast %140 : vector<1x128xf32> to vector<16x128xf32>
    %142 = arith.addf %139, %141 : vector<16x128xf32>
    %cst_58 = arith.constant 5.000000e-01 : f32
    %143 = vector.broadcast %cst_58 : f32 to vector<16x128xf32>
    %144 = arith.mulf %143, %142 : vector<16x128xf32>
    %cst_59 = arith.constant 0.707106769 : f32
    %145 = vector.broadcast %cst_59 : f32 to vector<16x128xf32>
    %146 = arith.mulf %142, %145 : vector<16x128xf32>
    %147 = math.erf %146 : vector<16x128xf32>
    %cst_60 = arith.constant 1.000000e+00 : f32
    %148 = vector.broadcast %cst_60 : f32 to vector<16x128xf32>
    %149 = arith.addf %148, %147 : vector<16x128xf32>
    %150 = arith.mulf %144, %149 : vector<16x128xf32>
    %151 = arith.truncf %150 : vector<16x128xf32> to vector<16x128xbf16>
    %c0_61 = arith.constant 0 : index
    %c0_62 = arith.constant 0 : index
    %152 = vector.load %arg13[%c0_61, %c0_62] : memref<128x128xbf16, #tpu.memory_space<vmem>>, vector<128x128xbf16>
    %cst_63 = arith.constant dense<0.000000e+00> : vector<16x128xf32>
    %153 = tpu.matmul %151, %152, %cst_63 {dimension_numbers = #tpu.dot_dimension_numbers<[1], [0], [0], [1], [0, 0, 1, 1], [], []>} : vector<16x128xbf16>, vector<128x128xbf16>, vector<16x128xf32> -> vector<16x128xf32>
    %c0_64 = arith.constant 0 : index
    %c0_65 = arith.constant 0 : index
    %154 = vector.load %arg14[%c0_64, %c0_65] : memref<1x128xf32, #tpu.memory_space<vmem>>, vector<1x128xf32>
    %155 = vector.broadcast %154 : vector<1x128xf32> to vector<16x128xf32>
    %156 = arith.addf %153, %155 : vector<16x128xf32>
    %157 = vector.broadcast %110 : vector<16x1xf32> to vector<16x128xf32>
    %158 = arith.mulf %156, %157 : vector<16x128xf32>
    %159 = arith.addf %109, %158 : vector<16x128xf32>
    %160 = arith.truncf %159 : vector<16x128xf32> to vector<16x128xbf16>
    %c0_66 = arith.constant 0 : index
    %c0_67 = arith.constant 0 : index
    %161 = vector.load %arg15[%c0_66, %c0_67] : memref<16x128xbf16, #tpu.memory_space<vmem>>, vector<16x128xbf16>
    tpu.vector_store %arg15[%c0_66, %c0_67], %160 {strides = array<i32>} : memref<16x128xbf16, #tpu.memory_space<vmem>>, vector<16x128xbf16>,
    return
  }
  func.func @transform_0(%arg0: i32) -> (i32, i32) {
    %c0_i32 = arith.constant 0 : i32
    %c0_i32_0 = arith.constant 0 : i32
    return %arg0, %c0_i32 : i32, i32
  }
  func.func @transform_1(%arg0: i32) -> (i32, i32) {
    %c0_i32 = arith.constant 0 : i32
    %c0_i32_0 = arith.constant 0 : i32
    return %arg0, %c0_i32 : i32, i32
  }
  func.func @transform_2(%arg0: i32) -> (i32, i32) {
    %c0_i32 = arith.constant 0 : i32
    %c0_i32_0 = arith.constant 0 : i32
    %c0_i32_1 = arith.constant 0 : i32
    return %c0_i32, %c0_i32_0 : i32, i32
  }
  func.func @transform_3(%arg0: i32) -> (i32, i32) {
    %c0_i32 = arith.constant 0 : i32
    %c0_i32_0 = arith.constant 0 : i32
    %c0_i32_1 = arith.constant 0 : i32
    return %c0_i32, %c0_i32_0 : i32, i32
  }
  func.func @transform_4(%arg0: i32) -> (i32, i32) {
    %c0_i32 = arith.constant 0 : i32
    %c0_i32_0 = arith.constant 0 : i32
    %c0_i32_1 = arith.constant 0 : i32
    return %c0_i32, %c0_i32_0 : i32, i32
  }
  func.func @transform_5(%arg0: i32) -> (i32, i32) {
    %c0_i32 = arith.constant 0 : i32
    %c0_i32_0 = arith.constant 0 : i32
    %c0_i32_1 = arith.constant 0 : i32
    return %c0_i32, %c0_i32_0 : i32, i32
  }
  func.func @transform_6(%arg0: i32) -> (i32, i32) {
    %c0_i32 = arith.constant 0 : i32
    %c0_i32_0 = arith.constant 0 : i32
    %c0_i32_1 = arith.constant 0 : i32
    return %c0_i32, %c0_i32_0 : i32, i32
  }
  func.func @transform_7(%arg0: i32) -> (i32, i32) {
    %c0_i32 = arith.constant 0 : i32
    %c0_i32_0 = arith.constant 0 : i32
    %c0_i32_1 = arith.constant 0 : i32
    return %c0_i32, %c0_i32_0 : i32, i32
  }
  func.func @transform_8(%arg0: i32) -> (i32, i32) {
    %c0_i32 = arith.constant 0 : i32
    %c0_i32_0 = arith.constant 0 : i32
    %c0_i32_1 = arith.constant 0 : i32
    return %c0_i32, %c0_i32_0 : i32, i32
  }
  func.func @transform_9(%arg0: i32) -> (i32, i32) {
    %c0_i32 = arith.constant 0 : i32
    %c0_i32_0 = arith.constant 0 : i32
    %c0_i32_1 = arith.constant 0 : i32
    return %c0_i32, %c0_i32_0 : i32, i32
  }
  func.func @transform_10(%arg0: i32) -> (i32, i32) {
    %c0_i32 = arith.constant 0 : i32
    %c0_i32_0 = arith.constant 0 : i32
    %c0_i32_1 = arith.constant 0 : i32
    return %c0_i32, %c0_i32_0 : i32, i32
  }
  func.func @transform_11(%arg0: i32) -> (i32, i32) {
    %c0_i32 = arith.constant 0 : i32
    %c0_i32_0 = arith.constant 0 : i32
    %c0_i32_1 = arith.constant 0 : i32
    return %c0_i32, %c0_i32_0 : i32, i32
  }
  func.func @transform_12(%arg0: i32) -> (i32, i32) {
    %c0_i32 = arith.constant 0 : i32
    %c0_i32_0 = arith.constant 0 : i32
    %c0_i32_1 = arith.constant 0 : i32
    return %c0_i32, %c0_i32_0 : i32, i32
  }
  func.func @transform_13(%arg0: i32) -> (i32, i32) {
    %c0_i32 = arith.constant 0 : i32
    %c0_i32_0 = arith.constant 0 : i32
    %c0_i32_1 = arith.constant 0 : i32
    return %c0_i32, %c0_i32_0 : i32, i32
  }
  func.func @transform_14(%arg0: i32) -> (i32, i32) {
    %c0_i32 = arith.constant 0 : i32
    %c0_i32_0 = arith.constant 0 : i32
    return %arg0, %c0_i32 : i32, i32
  }
}

</mosaic_0001>

<bundles_post_ra>
// kernel: tpu_custom_call.1
= control target key start
LH: loop header
LB: loop body
LE: loop exit
PB: predicated region body
PF: predicated region fallthrough
CT: control target
= control target key end

     0   :  { %19 = vsyncpa [#allocation3], 0  ;;  %s1821_s0 = inlined_call_operand.hbm [shape: bf16[16,128], index: 0, kind: input, shape index: {}]   ;;  %s1822_s1 = inlined_call_operand.hbm [shape: f32[16,1], index: 1, kind: input, shape index: {}]   ;;  %s1823_s2 = inlined_call_operand.hbm [shape: f32[1,128], index: 2, kind: input, shape index: {}]   ;;  %s1824_s3 = inlined_call_operand.hbm [shape: f32[1,128], index: 3, kind: input, shape index: {}]   ;;  %s1825_s4 = inlined_call_operand.hbm [shape: bf16[32,8], index: 4, kind: input, shape index: {}]   ;;  %s1826_s5 = inlined_call_operand.hbm [shape: f32[32,128], index: 5, kind: input, shape index: {}]   ;;  %s1827_s6 = inlined_call_operand.hbm [shape: bf16[8,32], index: 6, kind: input, shape index: {}]   ;;  %s1828_s7 = inlined_call_operand.hbm [shape: f32[8,128], index: 7, kind: input, shape index: {}]   ;;  %s1829_s8 = inlined_call_operand.hbm [shape: f32[1,128], index: 8, kind: input, shape index: {}]   ;;  %s1830_s9 = inlined_call_operand.hbm [shape: f32[1,128], index: 9, kind: input, shape index: {}]   ;;  %s1831_s10 = inlined_call_operand.hbm [shape: bf16[128,128], index: 10, kind: input, shape index: {}]   ;;  %s1832_s11 = inlined_call_operand.hbm [shape: f32[1,128], index: 11, kind: input, shape index: {}]   ;;  %s1833_s12 = inlined_call_operand.hbm [shape: bf16[128,128], index: 12, kind: input, shape index: {}]   ;;  %s1834_s13 = inlined_call_operand.hbm [shape: f32[1,128], index: 13, kind: input, shape index: {}]   ;;  %s1835_s14 = inlined_call_operand.hbm [shape: bf16[16,128], index: 14, kind: output, shape index: {}]  }
   0x1   :  { %20 = vsyncpa [#allocation6], 0 }
   0x2   :  { %21 = vsyncpa [#allocation9], 0 }
   0x3   :  { %22 = vsyncpa [#allocation12], 0 }
   0x4   :  { %23 = vsyncpa [#allocation15], 0 }
   0x5   :  { %24 = vsyncpa [#allocation18], 0 }
   0x6   :  { %25 = vsyncpa [#allocation21], 0 }
   0x7   :  { %26 = vsyncpa [#allocation24], 0 }
   0x8   :  { %27 = vsyncpa [#allocation4], 0  ;;  %s1455_s29 = smov [#allocation5]   ;;  %s1107_s17 = scalar_lea.hbm %s1822_s1, 256 }
   0x9   :  { %s45_s30 = sshll.u32 %s1455_s29, 4  ;;  %p1108_p0 = scmp.ne.s32.totalorder %s1822_s1, %s1107_s17  ;;  %s46_s30 = int_to_ptr.vmem [resolvable:$true] %s45_s30 }
   0xa   :  { %p1111_p1 = scmp.lt.u32.totalorder %s1107_s17, %s1822_s1 }
   0xc   :  { %p1113_p2 = pnand %p1111_p1, %p1108_p0 }
   0xe   :  { %1116 = shalt.err (!%p1113_p2)
}
   0xf   :  { %s1117_s22 = scalar_lea.vmem %s46_s30, 256  ;;  %p1122_p4 = scmp.lt.s32.totalorder %s46_s30, %s46_s30 }
  0x10   :  { %p1118_p3 = scmp.ne.s32.totalorder %s46_s30, %s1117_s22  ;;  %p1123_p5 = scmp.lt.s32.totalorder %s1117_s22, %s1117_s22 }
  0x12   :  { %p1124_p6 = por %p1123_p5, %p1122_p4 }
  0x14   :  { %p1125_p7 = pnand %p1124_p6, %p1118_p3 }
  0x16   :  { %1128 = shalt.err (!%p1125_p7)
}
  0x17   :  { %s1456_s23 = smov 128   ;;  %s1457_s24 = smov 8  }
  0x18   :  { %51 = dma.hbm_to_vmem [thread:$0]  %s1822_s1, 256, %s46_s30, [#allocation6], %s1456_s23, %s1456_s23, %s1457_s24  }
  0x19   :  { %s1458_s27 = smov [#allocation8]   ;;  %s1459_s29 = smov [#allocation11]  }
  0x1a   :  { %s68_s28 = sshll.u32 %s1458_s27, 4  ;;  %s89_s15 = sshll.u32 %s1459_s29, 4  ;;  %s69_s28 = int_to_ptr.vmem [resolvable:$true] %s68_s28  ;;  %s90_s15 = int_to_ptr.vmem [resolvable:$true] %s89_s15 }
  0x1b   :  { %s1129_s18 = scalar_lea.hbm %s1824_s3, 16 }
  0x1c   :  { %p1130_p8 = scmp.ne.s32.totalorder %s1824_s3, %s1129_s18  ;;  %p1133_p9 = scmp.lt.u32.totalorder %s1129_s18, %s1824_s3 }
  0x1e   :  { %p1135_p10 = pnand %p1133_p9, %p1130_p8 }
  0x20   :  { %1138 = shalt.err (!%p1135_p10)
}
  0x21   :  { %s1139_s1 = scalar_lea.vmem %s69_s28, 16  ;;  %s1143_s30 = scalar_lea.vmem %s69_s28, 32 }
  0x22   :  { %p1140_p11 = scmp.ne.s32.totalorder %s69_s28, %s1139_s1  ;;  %p1144_p12 = scmp.lt.s32.totalorder %s69_s28, %s69_s28 }
  0x23   :  { %p1145_p13 = scmp.lt.s32.totalorder %s1143_s30, %s1139_s1 }
  0x25   :  { %p1146_p0 = por %p1145_p13, %p1144_p12 }
  0x27   :  { %p1147_p1 = pnand %p1146_p0, %p1140_p11 }
  0x29   :  { %1150 = shalt.err (!%p1147_p1)
}
  0x2a   :  { %71 = dma.hbm_to_vmem [thread:$0]  %s1824_s3, 16, %s69_s28, [#allocation9]  }
  0x2b   :  { %s1151_s16 = scalar_lea.hbm %s1826_s5, 512 }
  0x2c   :  { %p1152_p2 = scmp.ne.s32.totalorder %s1826_s5, %s1151_s16  ;;  %p1155_p3 = scmp.lt.u32.totalorder %s1151_s16, %s1826_s5 }
  0x2e   :  { %p1157_p4 = pnand %p1155_p3, %p1152_p2 }
  0x30   :  { %1160 = shalt.err (!%p1157_p4)
}
  0x31   :  { %s1161_s21 = scalar_lea.vmem %s90_s15, 512  ;;  %p1166_p6 = scmp.lt.s32.totalorder %s90_s15, %s90_s15 }
  0x32   :  { %p1162_p5 = scmp.ne.s32.totalorder %s90_s15, %s1161_s21  ;;  %p1167_p7 = scmp.lt.s32.totalorder %s1161_s21, %s1161_s21 }
  0x34   :  { %p1168_p8 = por %p1167_p7, %p1166_p6 }
  0x36   :  { %p1169_p9 = pnand %p1168_p8, %p1162_p5 }
  0x38   :  { %1172 = shalt.err (!%p1169_p9)
}
  0x39   :  { %95 = dma.hbm_to_vmem [thread:$0]  %s1826_s5, 512, %s90_s15, [#allocation12], %s1456_s23, %s1456_s23, %s1457_s24  }
  0x3a   :  { %s1460_s22 = smov [#allocation14]   ;;  %s1461_s30 = smov [#allocation17]  }
  0x3b   :  { %s112_s1 = sshll.u32 %s1460_s22, 4  ;;  %s132_s25 = sshll.u32 %s1461_s30, 4  ;;  %s113_s1 = int_to_ptr.vmem [resolvable:$true] %s112_s1  ;;  %s133_s25 = int_to_ptr.vmem [resolvable:$true] %s132_s25 }
  0x3c   :  { %s1173_s29 = scalar_lea.hbm %s1828_s7, 128 }
  0x3d   :  { %p1174_p10 = scmp.ne.s32.totalorder %s1828_s7, %s1173_s29  ;;  %p1177_p11 = scmp.lt.u32.totalorder %s1173_s29, %s1828_s7 }
  0x3f   :  { %p1179_p12 = pnand %p1177_p11, %p1174_p10 }
  0x41   :  { %1182 = shalt.err (!%p1179_p12)
}
  0x42   :  { %s1183_s5 = scalar_lea.vmem %s113_s1, 128  ;;  %p1188_p0 = scmp.lt.s32.totalorder %s113_s1, %s113_s1 }
  0x43   :  { %p1184_p13 = scmp.ne.s32.totalorder %s113_s1, %s1183_s5  ;;  %p1189_p1 = scmp.lt.s32.totalorder %s1183_s5, %s1183_s5 }
  0x45   :  { %p1190_p2 = por %p1189_p1, %p1188_p0 }
  0x47   :  { %p1191_p3 = pnand %p1190_p2, %p1184_p13 }
  0x49   :  { %1194 = shalt.err (!%p1191_p3)
}
  0x4a   :  { %115 = dma.hbm_to_vmem [thread:$0]  %s1828_s7, 128, %s113_s1, [#allocation15]  }
  0x4b   :  { %s1195_s21 = scalar_lea.hbm %s1830_s9, 16 }
  0x4c   :  { %p1196_p4 = scmp.ne.s32.totalorder %s1830_s9, %s1195_s21  ;;  %p1199_p5 = scmp.lt.u32.totalorder %s1195_s21, %s1830_s9 }
  0x4e   :  { %p1201_p6 = pnand %p1199_p5, %p1196_p4 }
  0x50   :  { %1204 = shalt.err (!%p1201_p6)
}
  0x51   :  { %s1205_s26 = scalar_lea.vmem %s133_s25, 16  ;;  %s1209_s27 = scalar_lea.vmem %s133_s25, 32 }
  0x52   :  { %p1206_p7 = scmp.ne.s32.totalorder %s133_s25, %s1205_s26  ;;  %p1210_p8 = scmp.lt.s32.totalorder %s133_s25, %s133_s25 }
  0x53   :  { %p1211_p9 = scmp.lt.s32.totalorder %s1209_s27, %s1205_s26 }
  0x55   :  { %p1212_p10 = por %p1211_p9, %p1210_p8 }
  0x57   :  { %p1213_p11 = pnand %p1212_p10, %p1206_p7 }
  0x59   :  { %1216 = shalt.err (!%p1213_p11)
}
  0x5a   :  { %135 = dma.hbm_to_vmem [thread:$0]  %s1830_s9, 16, %s133_s25, [#allocation18]  }
  0x5b   :  { %s1462_s29 = smov [#allocation20]   ;;  %s1463_s17 = smov [#allocation2]  }
  0x5c   :  { %s154_s16 = sshll.u32 %s1462_s29, 4  ;;  %s33_s18 = sshll.u32 %s1463_s17, 4  ;;  %s155_s16 = int_to_ptr.vmem [resolvable:$true] %s154_s16  ;;  %s34_s18 = int_to_ptr.vmem [resolvable:$true] %s33_s18 }
  0x5d   :  { %s1217_s23 = scalar_lea.hbm %s1832_s11, 16 }
  0x5e   :  { %p1218_p12 = scmp.ne.s32.totalorder %s1832_s11, %s1217_s23  ;;  %p1221_p13 = scmp.lt.u32.totalorder %s1217_s23, %s1832_s11 }
  0x60   :  { %p1223_p0 = pnand %p1221_p13, %p1218_p12 }
  0x62   :  { %1226 = shalt.err (!%p1223_p0)
}
  0x63   :  { %s1227_s9 = scalar_lea.vmem %s155_s16, 16  ;;  %s1231_s25 = scalar_lea.vmem %s155_s16, 32 }
  0x64   :  { %p1228_p1 = scmp.ne.s32.totalorder %s155_s16, %s1227_s9  ;;  %p1232_p2 = scmp.lt.s32.totalorder %s155_s16, %s155_s16 }
  0x65   :  { %p1233_p3 = scmp.lt.s32.totalorder %s1231_s25, %s1227_s9 }
  0x67   :  { %p1234_p4 = por %p1233_p3, %p1232_p2 }
  0x69   :  { %p1235_p5 = pnand %p1234_p4, %p1228_p1 }
  0x6b   :  { %1238 = shalt.err (!%p1235_p5)
}
  0x6c   :  { %157 = dma.hbm_to_vmem [thread:$0]  %s1832_s11, 16, %s155_s16, [#allocation21]  }
  0x6d   :  { %s1239_s26 = scalar_lea.hbm %s1821_s0, 128 }
  0x6e   :  { %p1240_p6 = scmp.ne.s32.totalorder %s1821_s0, %s1239_s26  ;;  %p1243_p7 = scmp.lt.u32.totalorder %s1239_s26, %s1821_s0 }
  0x70   :  { %p1245_p8 = pnand %p1243_p7, %p1240_p6 }
  0x72   :  { %1248 = shalt.err (!%p1245_p8)
}
  0x73   :  { %s1249_s17 = scalar_lea.vmem %s34_s18, 128  ;;  %p1254_p10 = scmp.lt.s32.totalorder %s34_s18, %s34_s18 }
  0x74   :  { %p1250_p9 = scmp.ne.s32.totalorder %s34_s18, %s1249_s17  ;;  %p1255_p11 = scmp.lt.s32.totalorder %s1249_s17, %s1249_s17 }
  0x76   :  { %p1256_p12 = por %p1255_p11, %p1254_p10 }
  0x78   :  { %p1257_p13 = pnand %p1256_p12, %p1250_p9 }
  0x7a   :  { %1260 = shalt.err (!%p1257_p13)
}
  0x7b   :  { %s1464_s11 = smov 64   ;;  %s1465_s16 = smov 4  }
  0x7c   :  { %39 = dma.hbm_to_vmem [thread:$0]  %s1821_s0, 128, %s34_s18, [#allocation3], %s1464_s11, %s1464_s11, %s1465_s16  }
  0x7d   :  { %s1466_s23 = smov [#allocation7]   ;;  %s1467_s15 = smov [#allocation10]  }
  0x7e   :  { %s58_s24 = sshll.u32 %s1466_s23, 4  ;;  %s77_s20 = sshll.u32 %s1467_s15, 4  ;;  %s59_s24 = int_to_ptr.vmem [resolvable:$true] %s58_s24  ;;  %s78_s20 = int_to_ptr.vmem [resolvable:$true] %s77_s20 }
  0x7f   :  { %s1261_s25 = scalar_lea.hbm %s1823_s2, 16 }
  0x80   :  { %p1262_p0 = scmp.ne.s32.totalorder %s1823_s2, %s1261_s25  ;;  %p1265_p1 = scmp.lt.u32.totalorder %s1261_s25, %s1823_s2 }
  0x82   :  { %p1267_p2 = pnand %p1265_p1, %p1262_p0 }
  0x84   :  { %1270 = shalt.err (!%p1267_p2)
}
  0x85   :  { %s1271_s0 = scalar_lea.vmem %s59_s24, 16  ;;  %s1275_s18 = scalar_lea.vmem %s59_s24, 32 }
  0x86   :  { %p1272_p3 = scmp.ne.s32.totalorder %s59_s24, %s1271_s0  ;;  %p1276_p4 = scmp.lt.s32.totalorder %s59_s24, %s59_s24 }
  0x87   :  { %p1277_p5 = scmp.lt.s32.totalorder %s1275_s18, %s1271_s0 }
  0x89   :  { %p1278_p6 = por %p1277_p5, %p1276_p4 }
  0x8b   :  { %p1279_p7 = pnand %p1278_p6, %p1272_p3 }
  0x8d   :  { %1282 = shalt.err (!%p1279_p7)
}
  0x8e   :  { %61 = dma.hbm_to_vmem [thread:$0]  %s1823_s2, 16, %s59_s24, [#allocation6]  }
  0x8f   :  { %s1283_s29 = scalar_lea.hbm %s1825_s4, 256 }
  0x90   :  { %p1284_p8 = scmp.ne.s32.totalorder %s1825_s4, %s1283_s29  ;;  %p1287_p9 = scmp.lt.u32.totalorder %s1283_s29, %s1825_s4 }
  0x92   :  { %p1289_p10 = pnand %p1287_p9, %p1284_p8 }
  0x94   :  { %1292 = shalt.err (!%p1289_p10)
}
  0x95   :  { %s1293_s15 = scalar_lea.vmem %s78_s20, 256  ;;  %p1298_p12 = scmp.lt.s32.totalorder %s78_s20, %s78_s20 }
  0x96   :  { %p1294_p11 = scmp.ne.s32.totalorder %s78_s20, %s1293_s15  ;;  %p1299_p13 = scmp.lt.s32.totalorder %s1293_s15, %s1293_s15 }
  0x98   :  { %p1300_p0 = por %p1299_p13, %p1298_p12 }
  0x9a   :  { %p1301_p1 = pnand %p1300_p0, %p1294_p11 }
  0x9c   :  { %1304 = shalt.err (!%p1301_p1)
}
  0x9d   :  { %83 = dma.hbm_to_vmem [thread:$0]  %s1825_s4, 256, %s78_s20, [#allocation9], %s1464_s11, %s1464_s11, %s1465_s16  }
  0x9e   :  { %s1468_s21 = smov [#allocation13]   ;;  %s1469_s25 = smov [#allocation16]  }
  0x9f   :  { %s102_s9 = sshll.u32 %s1468_s21, 4  ;;  %s122_s3 = sshll.u32 %s1469_s25, 4  ;;  %s103_s9 = int_to_ptr.vmem [resolvable:$true] %s102_s9  ;;  %s123_s3 = int_to_ptr.vmem [resolvable:$true] %s122_s3 }
  0xa0   :  { %s1305_s30 = scalar_lea.hbm %s1827_s6, 64 }
  0xa1   :  { %p1306_p2 = scmp.ne.s32.totalorder %s1827_s6, %s1305_s30  ;;  %p1309_p3 = scmp.lt.u32.totalorder %s1305_s30, %s1827_s6 }
  0xa3   :  { %p1311_p4 = pnand %p1309_p3, %p1306_p2 }
  0xa5   :  { %1314 = shalt.err (!%p1311_p4)
}
  0xa6   :  { %s1315_s4 = scalar_lea.vmem %s103_s9, 64  ;;  %p1320_p6 = scmp.lt.s32.totalorder %s103_s9, %s103_s9 }
  0xa7   :  { %p1316_p5 = scmp.ne.s32.totalorder %s103_s9, %s1315_s4  ;;  %p1321_p7 = scmp.lt.s32.totalorder %s1315_s4, %s1315_s4 }
  0xa9   :  { %p1322_p8 = por %p1321_p7, %p1320_p6 }
  0xab   :  { %p1323_p9 = pnand %p1322_p8, %p1316_p5 }
  0xad   :  { %1326 = shalt.err (!%p1323_p9)
}
  0xae   :  { %105 = dma.hbm_to_vmem [thread:$0]  %s1827_s6, 64, %s103_s9, [#allocation12]  }
  0xaf   :  { %s1327_s17 = scalar_lea.hbm %s1829_s8, 16 }
  0xb0   :  { %p1328_p10 = scmp.ne.s32.totalorder %s1829_s8, %s1327_s17  ;;  %p1331_p11 = scmp.lt.u32.totalorder %s1327_s17, %s1829_s8 }
  0xb2   :  { %p1333_p12 = pnand %p1331_p11, %p1328_p10 }
  0xb4   :  { %1336 = shalt.err (!%p1333_p12)
}
  0xb5   :  { %s1337_s2 = scalar_lea.vmem %s123_s3, 16  ;;  %s1341_s24 = scalar_lea.vmem %s123_s3, 32 }
  0xb6   :  { %p1338_p13 = scmp.ne.s32.totalorder %s123_s3, %s1337_s2  ;;  %p1342_p0 = scmp.lt.s32.totalorder %s123_s3, %s123_s3 }
  0xb7   :  { %p1343_p1 = scmp.lt.s32.totalorder %s1341_s24, %s1337_s2 }
  0xb9   :  { %p1344_p2 = por %p1343_p1, %p1342_p0 }
  0xbb   :  { %p1345_p3 = pnand %p1344_p2, %p1338_p13 }
  0xbd   :  { %1348 = shalt.err (!%p1345_p3)
}
  0xbe   :  { %125 = dma.hbm_to_vmem [thread:$0]  %s1829_s8, 16, %s123_s3, [#allocation15]  }
  0xbf   :  { %s1470_s9 = smov [#allocation19]   ;;  %s1471_s28 = smov [#allocation22]  }
  0xc0   :  { %s141_s25 = sshll.u32 %s1470_s9, 4  ;;  %s163_s22 = sshll.u32 %s1471_s28, 4  ;;  %s142_s25 = int_to_ptr.vmem [resolvable:$true] %s141_s25  ;;  %s164_s22 = int_to_ptr.vmem [resolvable:$true] %s163_s22 }
  0xc1   :  { %s1349_s18 = scalar_lea.hbm %s1831_s10, 1024 }
  0xc2   :  { %p1350_p4 = scmp.ne.s32.totalorder %s1831_s10, %s1349_s18  ;;  %p1353_p5 = scmp.lt.u32.totalorder %s1349_s18, %s1831_s10 }
  0xc4   :  { %p1355_p6 = pnand %p1353_p5, %p1350_p4 }
  0xc6   :  { %1358 = shalt.err (!%p1355_p6)
}
  0xc7   :  { %s1359_s8 = scalar_lea.vmem %s142_s25, 1024  ;;  %p1364_p8 = scmp.lt.s32.totalorder %s142_s25, %s142_s25 }
  0xc8   :  { %p1360_p7 = scmp.ne.s32.totalorder %s142_s25, %s1359_s8  ;;  %p1365_p9 = scmp.lt.s32.totalorder %s1359_s8, %s1359_s8 }
  0xca   :  { %p1366_p10 = por %p1365_p9, %p1364_p8 }
  0xcc   :  { %p1367_p11 = pnand %p1366_p10, %p1360_p7 }
  0xce   :  { %1370 = shalt.err (!%p1367_p11)
}
  0xcf   :  { %147 = dma.hbm_to_vmem [thread:$0]  %s1831_s10, 1024, %s142_s25, [#allocation18], %s1464_s11, %s1464_s11, %s1465_s16  }
  0xd0   :  { %s1371_s17 = scalar_lea.hbm %s1833_s12, 1024 }
  0xd1   :  { %p1372_p12 = scmp.ne.s32.totalorder %s1833_s12, %s1371_s17  ;;  %p1375_p13 = scmp.lt.u32.totalorder %s1371_s17, %s1833_s12 }
  0xd3   :  { %p1377_p0 = pnand %p1375_p13, %p1372_p12 }
  0xd5   :  { %1380 = shalt.err (!%p1377_p0)
}
  0xd6   :  { %s1381_s2 = scalar_lea.vmem %s164_s22, 1024  ;;  %p1386_p2 = scmp.lt.s32.totalorder %s164_s22, %s164_s22 }
  0xd7   :  { %p1382_p1 = scmp.ne.s32.totalorder %s164_s22, %s1381_s2  ;;  %p1387_p3 = scmp.lt.s32.totalorder %s1381_s2, %s1381_s2 }
  0xd9   :  { %p1388_p4 = por %p1387_p3, %p1386_p2 }
  0xdb   :  { %p1389_p5 = pnand %p1388_p4, %p1382_p1 }
  0xdd   :  { %1392 = shalt.err (!%p1389_p5)
}
  0xde   :  { %169 = dma.hbm_to_vmem [thread:$0]  %s1833_s12, 1024, %s164_s22, [#allocation21], %s1464_s11, %s1464_s11, %s1465_s16  }
  0xdf   :  { %s1472_s6 = smov [#allocation23]   ;;  %s1393_s28 = scalar_lea.hbm %s1834_s13, 16 }
  0xe0   :  { %s176_s21 = sshll.u32 %s1472_s6, 4  ;;  %p1394_p6 = scmp.ne.s32.totalorder %s1834_s13, %s1393_s28  ;;  %s177_s21 = int_to_ptr.vmem [resolvable:$true] %s176_s21 }
  0xe1   :  { %p1397_p7 = scmp.lt.u32.totalorder %s1393_s28, %s1834_s13 }
  0xe3   :  { %p1399_p8 = pnand %p1397_p7, %p1394_p6 }
  0xe5   :  { %1402 = shalt.err (!%p1399_p8)
}
  0xe6   :  { %s1403_s27 = scalar_lea.vmem %s177_s21, 16  ;;  %s1407_s12 = scalar_lea.vmem %s177_s21, 32 }
  0xe7   :  { %p1404_p9 = scmp.ne.s32.totalorder %s177_s21, %s1403_s27  ;;  %p1408_p10 = scmp.lt.s32.totalorder %s177_s21, %s177_s21 }
  0xe8   :  { %p1409_p11 = scmp.lt.s32.totalorder %s1407_s12, %s1403_s27 }
  0xea   :  { %p1410_p12 = por %p1409_p11, %p1408_p10 }
  0xec   :  { %p1411_p13 = pnand %p1410_p12, %p1404_p9 }
  0xee   :  { %1414 = shalt.err (!%p1411_p13)
}
  0xef   :  { %179 = dma.hbm_to_vmem [thread:$0]  %s1834_s13, 16, %s177_s21, [#allocation24]  }
  0xf0   :  { %1437 = dma.done.wait [#allocation3], 128  }
  0xf1   :  { %1438 = vsyncadd [#allocation3], 4294967168 }
  0xf2   :  { %1439 = dma.done.wait [#allocation6], 272  }
  0xf3   :  { %1440 = vsyncadd [#allocation6], 4294967024 }
  0xf4   :  { %1441 = dma.done.wait [#allocation9], 272  }
  0xf5   :  { %1442 = vsyncadd [#allocation9], 4294967024 }
  0xf6   :  { %1443 = dma.done.wait [#allocation12], 576  }
  0xf7   :  { %1444 = vsyncadd [#allocation12], 4294966720 }
  0xf8   :  { %1445 = dma.done.wait [#allocation15], 144  }
  0xf9   :  { %1446 = vsyncadd [#allocation15], 4294967152 }
  0xfa   :  { %1447 = dma.done.wait [#allocation18], 1040  }
  0xfb   :  { %1448 = vsyncadd [#allocation18], 4294966256 }
  0xfc   :  { %1449 = dma.done.wait [#allocation21], 1040  }
  0xfd   :  { %1450 = vsyncadd [#allocation21], 4294966256 }
  0xfe   :  { %1451 = dma.done.wait [#allocation24], 16  }
  0xff   :  { %1452 = vsyncadd [#allocation24], 4294967280  ;;  %v413_v0 = vld [vmem:[#allocation2] sm:$0xff]   ;;  %vm277_vm0 = vcmask 64512   ;;  %v894_v25 = vld [vmem:[#allocation7] ss:$0 sm:$0xff] }
 0x100   :  { %v1738_v1 = vunpack.c.h.bf16 %v413_v0  ;;  %v1740_v2 = vunpack.c.l.bf16 %v413_v0  ;;  %v1061_v5 = vld [vmem:[#allocation10] sm:$0xff]   ;;  %v895_v29 = vld [vmem:[#allocation8] ss:$0 sm:$0xff]  ;;  %vm284_vm1 = vcmask 1043456   ;;  %v1062_v37 = vld [vmem:[#allocation10 + $0x8] sm:$0xff]   ;;  %v1473_v39 = vmov 0.0  }
 0x101   :  { %969 = vmatprep.mubr.msk.bf16.mxu0 %vm277_vm0, %v1061_v5  ;;  %973 = vmatprep.subr.bf16.mxu1 %v1473_v39  ;;  %vm1474_vm2 = vmmov 0   ;;  %v1760_v40 = vld [vmem:[#allocation5] sm:$0xff]  ;;  %v1762_v41 = vld [vmem:[#allocation5 + $0x8] sm:$0xff]  ;;  %v1475_v42 = vmov 0   ;;  %v231_v43 = vld [vmem:[#allocation11 + $0x10] sm:$0xff]  ;;  %vm359_vm3 = vcmask 261120  }
 0x102   :  { %417 = vadd.xlane.f32.xlu1 %v1738_v1  ;;  %238 = vadd.xlane.f32.xlu0 %v1740_v2  ;;  %v420_v3 = vmul.f32 %v1738_v1, %v1738_v1  ;;  %v241_v4 = vmul.f32 %v1740_v2, %v1740_v2  ;;  %v229_v44 = vld [vmem:[#allocation11] sm:$0xff]  ;;  %v232_v46 = vld [vmem:[#allocation11 + $0x18] sm:$0xff]  ;;  %v230_v49 = vld [vmem:[#allocation11 + $0x8] sm:$0xff]  ;;  %s1476_s13 = smov [#allocation25]  }
 0x103   :  { %977 = vmatprep.mubr.msk.bf16.mxu1 %vm1474_vm2, %v1473_v39  ;;  %1059 = vset.pattern.permute.xlu0 %v1475_v42  ;;  %s875_s20 = sshll.u32 %s1476_s13, 4  ;;  %s876_s20 = int_to_ptr.vmem [resolvable:$true] %s875_s20 }
 0x104   :  { %1060 = vset.pattern.permute.xlu1 %v1475_v42  ;;  %s1415_s8 = scalar_lea.vmem %s876_s20, 128  ;;  %p1420_p1 = scmp.lt.s32.totalorder %s876_s20, %s876_s20 }
 0x105   :  { %p1416_p0 = scmp.ne.s32.totalorder %s876_s20, %s1415_s8  ;;  %p1421_p2 = scmp.lt.s32.totalorder %s1415_s8, %s1415_s8 }
 0x106   :  { %421 = vadd.xlane.f32.xlu1 %v420_v3  ;;  %242 = vadd.xlane.f32.xlu0 %v241_v4 }
 0x107   :  { %p1422_p3 = por %p1421_p2, %p1420_p1 }
 0x109   :  { %p1423_p4 = pnand %p1422_p3, %p1416_p0 }
 0x117   :  { %550 = vperm.xlu1 %1060, %v1762_v41  }
 0x11c   :  { %405 = vperm.xlu0 %1059, %v1760_v40  }
 0x18f   :  { %v418_v6 = vpop.xlane.xlu1 %417  ;;  %v239_v7 = vpop.xlane.xlu0 %238 }
 0x190   :  { %v419_v8 = vmul.f32 0.0625, %v418_v6  ;;  %v240_v9 = vmul.f32 0.0625, %v239_v7 }
 0x192   :  { %v424_v10 = vmul.f32 %v419_v8, %v419_v8  ;;  %v245_v13 = vmul.f32 %v240_v9, %v240_v9  ;;  %v427_v22 = vsub.f32 %v1738_v1, %v419_v8  ;;  %v248_v24 = vsub.f32 %v1740_v2, %v240_v9 }
 0x193   :  { %v422_v11 = vpop.xlane.xlu1 %421  ;;  %v243_v12 = vpop.xlane.xlu0 %242 }
 0x194   :  { %v423_v14 = vmul.f32 0.0625, %v422_v11  ;;  %v244_v15 = vmul.f32 0.0625, %v243_v12 }
 0x196   :  { %v425_v16 = vsub.f32 %v423_v14, %v424_v10  ;;  %v246_v17 = vsub.f32 %v244_v15, %v245_v13 }
 0x198   :  { %v426_v18 = vmax.f32 %v425_v16, 0.0  ;;  %v247_v19 = vmax.f32 %v246_v17, 0.0 }
 0x19a   :  { %v428_v20 = vadd.f32 1e-05, %v426_v18  ;;  %v249_v21 = vadd.f32 1e-05, %v247_v19 }
 0x19c   :  { %1079 = vrsqrt.f32 %v428_v20 }
 0x19d   :  { %1081 = vrsqrt.f32 %v249_v21 }
 0x1a6   :  { %v1080_v23 = vpop.eup %1079 }
 0x1a7   :  { %v1082_v26 = vpop.eup %1081  ;;  %v430_v27 = vmul.f32 %v1080_v23, %v427_v22 }
 0x1a8   :  { %v251_v28 = vmul.f32 %v1082_v26, %v248_v24 }
 0x1a9   :  { %v431_v30 = vmul.f32 %v894_v25, %v430_v27 }
 0x1aa   :  { %v258_v31 = vmul.f32 %v894_v25, %v251_v28 }
 0x1ab   :  { %v432_v33 = vadd.f32 %v895_v29, %v431_v30 }
 0x1ac   :  { %v265_v32 = vadd.f32 %v895_v29, %v258_v31 }
 0x1ad   :  { %v433_v35 = vpack.c.bf16 %v432_v33, %v432_v33 }
 0x1ae   :  { %v266_v34 = vpack.c.bf16 %v265_v32, %v265_v32 }
 0x1af   :  { %v435_v38 = vsel %vm284_vm1, %v433_v35, 0 }
 0x1b0   :  { %1035 = vmatprep.subr.msk.bf16.mxu0 %vm284_vm1, %v266_v34  ;;  %v286_v36 = vsel %vm284_vm1, %v266_v34, 0 }
 0x1b1   :  { %968 = vmatpush3.bf16.msra.mxu0 %v286_v36 }
 0x1b2   :  { %1036 = vmatprep.subr.msk.bf16.mxu0 %vm284_vm1, %v433_v35 }
 0x1b4   :  { %970 = vmatmul.mubr.msk.bf16.vlgmr.msra.gmra.mrb[0].mxu0 %vm277_vm0, %v1062_v37 }
 0x1b5   :  { %982 = vmatpush3.bf16.msra.mxu0 %v435_v38  ;;  %983 = vmatprep.mubr.msk.bf16.mxu0 %vm277_vm0, %v1061_v5 }
 0x1b6   :  { %995 = vmatprep.subr.bf16.mxu0 %v1473_v39 }
 0x1bc   :  { %984 = vmatmul.mubr.msk.bf16.vlgmr.msra.gmra.mrb[4].mxu0 %vm277_vm0, %v1062_v37 }
 0x1bd   :  { %1011 = vmatprep.mubr.msk.bf16.mxu0 %vm1474_vm2, %v1473_v39 }
 0x287   :  { %v971_v45 = vpop.f32.mrb[0].mxu0 }
 0x288   :  { %v331_v47 = vadd.f32 %v971_v45, %v231_v43  ;;  %v322_v48 = vpop.f32.mrb[1].mxu0 }
 0x289   :  { %v323_v50 = vadd.f32 %v322_v48, %v229_v44  ;;  %v972_v51 = vpop.f32.mrb[2].mxu0 }
 0x28a   :  { %v343_v52 = vmul.f32 0.70710677, %v331_v47  ;;  %v334_v53 = vadd.f32 %v972_v51, %v232_v46  ;;  %v325_v54 = vpop.f32.mrb[3].mxu0  ;;  %v339_v15 = vmul.f32 0.5, %v331_v47  ;;  %v406_v51 = vpop.permute.xlu0 %405 }
 0x28b   :  { %v341_v55 = vmul.f32 0.70710677, %v323_v50  ;;  %v326_v56 = vadd.f32 %v325_v54, %v230_v49  ;;  %v337_v18 = vmul.f32 0.5, %v323_v50 }
 0x28c   :  { %1083 = verf.f32 %v343_v52  ;;  %v344_v57 = vmul.f32 0.70710677, %v334_v53  ;;  %v340_v16 = vmul.f32 0.5, %v334_v53 }
 0x28d   :  { %1085 = verf.f32 %v341_v55  ;;  %v342_v58 = vmul.f32 0.70710677, %v326_v56  ;;  %v338_v19 = vmul.f32 0.5, %v326_v56 }
 0x28e   :  { %1087 = verf.f32 %v344_v57 }
 0x28f   :  { %1089 = verf.f32 %v342_v58  ;;  %v985_v59 = vpop.f32.mrb[4].mxu0 }
 0x290   :  { %v480_v60 = vadd.f32 %v985_v59, %v231_v43  ;;  %v471_v61 = vpop.f32.mrb[5].mxu0 }
 0x291   :  { %v472_v62 = vadd.f32 %v471_v61, %v229_v44  ;;  %v986_v63 = vpop.f32.mrb[6].mxu0 }
 0x292   :  { %v492_v0 = vmul.f32 0.70710677, %v480_v60  ;;  %v483_v3 = vadd.f32 %v986_v63, %v232_v46  ;;  %v474_v4 = vpop.f32.mrb[7].mxu0  ;;  %v488_v33 = vmul.f32 0.5, %v480_v60  ;;  %v233_v46 = vld [vmem:[#allocation13] sm:$0xf]  ;;  %v551_v60 = vpop.permute.xlu1 %550 }
 0x293   :  { %v490_v5 = vmul.f32 0.70710677, %v472_v62  ;;  %v475_v6 = vadd.f32 %v474_v4, %v230_v49  ;;  %v486_v36 = vmul.f32 0.5, %v472_v62  ;;  %v234_v49 = vld [vmem:[#allocation14] sm:$0xff] }
 0x294   :  { %1091 = verf.f32 %v492_v0  ;;  %v493_v7 = vmul.f32 0.70710677, %v483_v3  ;;  %v489_v34 = vmul.f32 0.5, %v483_v3 }
 0x295   :  { %1093 = verf.f32 %v490_v5  ;;  %v491_v8 = vmul.f32 0.70710677, %v475_v6  ;;  %v487_v37 = vmul.f32 0.5, %v475_v6 }
 0x296   :  { %v1084_v9 = vpop.eup %1083  ;;  %1095 = verf.f32 %v493_v7 }
 0x297   :  { %v1086_v10 = vpop.eup %1085  ;;  %v351_v11 = vadd.f32 1.0, %v1084_v9  ;;  %1097 = verf.f32 %v491_v8 }
 0x298   :  { %v1088_v12 = vpop.eup %1087  ;;  %v349_v13 = vadd.f32 1.0, %v1086_v10  ;;  %v1064_v10 = vld [vmem:[#allocation19 + $0x8] sm:$0xff]  }
 0x299   :  { %v1090_v14 = vpop.eup %1089  ;;  %v352_v17 = vadd.f32 1.0, %v1088_v12  ;;  %v355_v21 = vmul.f32 %v351_v11, %v339_v15  ;;  %v1065_v11 = vld [vmem:[#allocation19 + $0x10] sm:$0xff]   ;;  %v1066_v12 = vld [vmem:[#allocation19 + $0x18] sm:$0xff]  }
 0x29a   :  { %v350_v20 = vadd.f32 1.0, %v1090_v14  ;;  %v353_v23 = vmul.f32 %v349_v13, %v337_v18  ;;  %v1067_v13 = vld [vmem:[#allocation19 + $0x20] sm:$0xff]   ;;  %v1068_v14 = vld [vmem:[#allocation19 + $0x28] sm:$0xff]   ;;  %v1070_v15 = vld [vmem:[#allocation19 + $0x38] sm:$0xff]  }
 0x29b   :  { %v356_v22 = vmul.f32 %v352_v17, %v340_v16  ;;  %v1072_v16 = vld [vmem:[#allocation22 + $0x8] sm:$0xff]  }
 0x29c   :  { %v354_v24 = vmul.f32 %v350_v20, %v338_v19 }
 0x29d   :  { %v358_v25 = vpack.c.bf16 %v356_v22, %v355_v21 }
 0x29e   :  { %v1092_v26 = vpop.eup %1091  ;;  %v357_v27 = vpack.c.bf16 %v354_v24, %v353_v23 }
 0x29f   :  { %v1094_v28 = vpop.eup %1093  ;;  %v500_v29 = vadd.f32 1.0, %v1092_v26 }
 0x2a0   :  { %v1096_v30 = vpop.eup %1095  ;;  %v498_v31 = vadd.f32 1.0, %v1094_v28  ;;  %974 = vmatpush3.bf16.msra.mxu1 %v357_v27 }
 0x2a1   :  { %v1098_v32 = vpop.eup %1097  ;;  %v501_v35 = vadd.f32 1.0, %v1096_v30  ;;  %975 = vmatprep.subr.bf16.mxu1 %v1473_v39  ;;  %v504_v42 = vmul.f32 %v500_v29, %v488_v33 }
 0x2a2   :  { %v499_v38 = vadd.f32 1.0, %v1098_v32  ;;  %v502_v44 = vmul.f32 %v498_v31, %v486_v36  ;;  %v904_v36 = vld [vmem:[#allocation16] ss:$0 sm:$0xff] }
 0x2a3   :  { %v505_v43 = vmul.f32 %v501_v35, %v489_v34 }
 0x2a4   :  { %v503_v45 = vmul.f32 %v499_v38, %v487_v37  ;;  %976 = vmatpush3.bf16.msra.mxu1 %v358_v25 }
 0x2a5   :  { %v507_v47 = vpack.c.bf16 %v505_v43, %v504_v42  ;;  %987 = vmatprep.subr.bf16.mxu1 %v1473_v39 }
 0x2a6   :  { %v506_v48 = vpack.c.bf16 %v503_v45, %v502_v44  ;;  %v905_v44 = vld [vmem:[#allocation17] ss:$0 sm:$0xff] }
 0x2a7   :  { %978 = vmatmul.mubr.msk.bf16.vlgmr.msra.gmra.mrb[0].mxu1 %vm359_vm3, %v233_v46 }
 0x2a8   :  { %988 = vmatpush3.bf16.msra.mxu1 %v506_v48  ;;  %991 = vmatprep.mubr.msk.bf16.mxu1 %vm1474_vm2, %v1473_v39 }
 0x2a9   :  { %989 = vmatprep.subr.bf16.mxu1 %v1473_v39 }
 0x2ac   :  { %990 = vmatpush3.bf16.msra.mxu1 %v507_v47 }
 0x2ad   :  { %1015 = vmatprep.subr.bf16.mxu1 %v1473_v39 }
 0x2af   :  { %992 = vmatmul.mubr.msk.bf16.vlgmr.msra.gmra.mrb[4].mxu1 %vm359_vm3, %v233_v46 }
 0x2b0   :  { %1031 = vmatprep.mubr.msk.bf16.mxu1 %vm1474_vm2, %v1473_v39 }
 0x37a   :  { %v397_v50 = vpop.f32.mrb[0].mxu1 }
 0x37b   :  { %v398_v52 = vadd.f32 %v397_v50, %v234_v49  ;;  %v979_v53 = vpop.f32.mrb[1].mxu1  ;;  %v1074_v50 = vld [vmem:[#allocation22 + $0x18] sm:$0xff]  }
 0x37c   :  { %v400_v54 = vpop.f32.mrb[2].mxu1  ;;  %v1077_v53 = vld [vmem:[#allocation22 + $0x30] sm:$0xff]  }
 0x37d   :  { %v408_v55 = vmul.f32 %v406_v51, %v398_v52  ;;  %v980_v56 = vpop.f32.mrb[3].mxu1  ;;  %v1075_v51 = vld [vmem:[#allocation22 + $0x20] sm:$0xff]   ;;  %v1076_v52 = vld [vmem:[#allocation22 + $0x28] sm:$0xff]   ;;  %v1078_v54 = vld [vmem:[#allocation22 + $0x38] sm:$0xff]  }
 0x37f   :  { %v409_v57 = vadd.f32 %v408_v55, %v1740_v2  ;;  %v906_v55 = vld [vmem:[#allocation20] ss:$0 sm:$0xff] }
 0x381   :  { %v410_v58 = vpack.c.bf16 %v409_v57, %v409_v57 }
 0x382   :  { %v542_v59 = vpop.f32.mrb[4].mxu1 }
 0x383   :  { %411 = vst [vmem:[#allocation25] sm:$0xf] %v410_v58  ;;  %v543_v61 = vadd.f32 %v542_v59, %v234_v49  ;;  %v993_v62 = vpop.f32.mrb[5].mxu1  ;;  %v1073_v49 = vld [vmem:[#allocation22 + $0x10] sm:$0xff]  }
 0x384   :  { %v545_v63 = vpop.f32.mrb[6].mxu1 }
 0x385   :  { %v553_v0 = vmul.f32 %v551_v60, %v543_v61  ;;  %v994_v3 = vpop.f32.mrb[7].mxu1 }
 0x387   :  { %v554_v4 = vadd.f32 %v553_v0, %v1738_v1  ;;  %v1063_v1 = vld [vmem:[#allocation19] sm:$0xff]  }
 0x388   :  { %996 = vmatpush3.bf16.msra.mxu0 %v1063_v1 }
 0x389   :  { %v555_v5 = vpack.c.bf16 %v554_v4, %v554_v4  ;;  %997 = vmatprep.subr.bf16.mxu0 %v1473_v39 }
 0x38b   :  { %557 = vst [vmem:[#allocation25 + $0x4] sm:$0xf] %v555_v5 }
 0x38c   :  { %998 = vmatpush3.bf16.msra.mxu0 %v1064_v10  ;;  %v915_v10 = vld [vmem:[#allocation23] ss:$0 sm:$0xff] }
 0x38d   :  { %999 = vmatprep.subr.bf16.mxu0 %v1473_v39 }
 0x390   :  { %1000 = vmatpush3.bf16.msra.mxu0 %v1065_v11 }
 0x391   :  { %1001 = vmatprep.subr.bf16.mxu0 %v1473_v39 }
 0x392   :  { %v929_v6 = vld [vmem:[#allocation25] sm:$0xff]  }
 0x393   :  { %v1776_v7 = vunpack.c.h.bf16 %v929_v6  ;;  %v1778_v8 = vunpack.c.l.bf16 %v929_v6 }
 0x394   :  { %1002 = vmatpush3.bf16.msra.mxu0 %v1066_v12 }
 0x395   :  { %568 = vadd.xlane.f32.xlu0 %v1776_v7  ;;  %566 = vadd.xlane.f32.xlu1 %v1778_v8  ;;  %v572_v2 = vmul.f32 %v1778_v8, %v1778_v8  ;;  %v573_v9 = vmul.f32 %v1776_v7, %v1776_v7 }
 0x396   :  { %1003 = vmatprep.subr.bf16.mxu0 %v1473_v39 }
 0x398   :  { %1004 = vmatpush3.bf16.msra.mxu0 %v1067_v13 }
 0x399   :  { %574 = vadd.xlane.f32.xlu1 %v572_v2  ;;  %1005 = vmatprep.subr.bf16.mxu0 %v1473_v39 }
 0x39c   :  { %1006 = vmatpush3.bf16.msra.mxu0 %v1068_v14 }
 0x39d   :  { %576 = vadd.xlane.f32.xlu1 %v573_v9  ;;  %1007 = vmatprep.subr.bf16.mxu0 %v1473_v39 }
 0x3ab   :  { %853 = vperm.xlu0 %1059, %v1762_v41   ;;  %v1069_v41 = vld [vmem:[#allocation19 + $0x30] sm:$0xff]  }
 0x3ac   :  { %1008 = vmatpush3.bf16.msra.mxu0 %v1069_v41 }
 0x3ad   :  { %1009 = vmatprep.subr.bf16.mxu0 %v1473_v39 }
 0x3ae   :  { %848 = vperm.xlu1 %1060, %v1760_v40   ;;  %v1071_v40 = vld [vmem:[#allocation22] sm:$0xff]  }
 0x3af   :  { %1016 = vmatpush3.bf16.msra.mxu1 %v1071_v40 }
 0x3b0   :  { %1010 = vmatpush3.bf16.msra.mxu0 %v1070_v15  ;;  %1017 = vmatprep.subr.bf16.mxu1 %v1473_v39 }
 0x3b3   :  { %1018 = vmatpush3.bf16.msra.mxu1 %v1072_v16 }
 0x3b4   :  { %1019 = vmatprep.subr.bf16.mxu1 %v1473_v39 }
 0x3b7   :  { %1020 = vmatpush3.bf16.msra.mxu1 %v1073_v49 }
 0x3b8   :  { %1021 = vmatprep.subr.bf16.mxu1 %v1473_v39 }
 0x3bb   :  { %1022 = vmatpush3.bf16.msra.mxu1 %v1074_v50 }
 0x3bc   :  { %1023 = vmatprep.subr.bf16.mxu1 %v1473_v39 }
 0x3bf   :  { %1024 = vmatpush3.bf16.msra.mxu1 %v1075_v51 }
 0x3c0   :  { %1025 = vmatprep.subr.bf16.mxu1 %v1473_v39 }
 0x3c3   :  { %1026 = vmatpush3.bf16.msra.mxu1 %v1076_v52 }
 0x3c4   :  { %1027 = vmatprep.subr.bf16.mxu1 %v1473_v39 }
 0x3c7   :  { %1028 = vmatpush3.bf16.msra.mxu1 %v1077_v53 }
 0x3c8   :  { %1029 = vmatprep.subr.bf16.mxu1 %v1473_v39 }
 0x3cb   :  { %1030 = vmatpush3.bf16.msra.mxu1 %v1078_v54 }
 0x422   :  { %v567_v17 = vpop.xlane.xlu1 %566  ;;  %v569_v19 = vpop.xlane.xlu0 %568 }
 0x423   :  { %v570_v18 = vmul.f32 0.0625, %v567_v17  ;;  %v571_v21 = vmul.f32 0.0625, %v569_v19 }
 0x425   :  { %v580_v22 = vmul.f32 %v570_v18, %v570_v18  ;;  %v581_v26 = vmul.f32 %v571_v21, %v571_v21  ;;  %v586_v33 = vsub.f32 %v1778_v8, %v570_v18  ;;  %v587_v37 = vsub.f32 %v1776_v7, %v571_v21 }
 0x426   :  { %v575_v20 = vpop.xlane.xlu1 %574 }
 0x427   :  { %v578_v23 = vmul.f32 0.0625, %v575_v20 }
 0x429   :  { %v582_v24 = vsub.f32 %v578_v23, %v580_v22 }
 0x42a   :  { %v577_v25 = vpop.xlane.xlu1 %576  ;;  %v854_v17 = vpop.permute.xlu0 %853 }
 0x42b   :  { %v584_v27 = vmax.f32 %v582_v24, 0.0  ;;  %v579_v28 = vmul.f32 0.0625, %v577_v25 }
 0x42d   :  { %v588_v29 = vadd.f32 1e-05, %v584_v27  ;;  %v583_v30 = vsub.f32 %v579_v28, %v581_v26 }
 0x42e   :  { %v849_v14 = vpop.permute.xlu1 %848 }
 0x42f   :  { %1099 = vrsqrt.f32 %v588_v29  ;;  %v585_v31 = vmax.f32 %v583_v30, 0.0 }
 0x431   :  { %v589_v32 = vadd.f32 1e-05, %v585_v31 }
 0x433   :  { %1101 = vrsqrt.f32 %v589_v32 }
 0x439   :  { %v1100_v34 = vpop.eup %1099 }
 0x43a   :  { %v592_v35 = vmul.f32 %v1100_v34, %v586_v33 }
 0x43c   :  { %v600_v43 = vmul.f32 %v904_v36, %v592_v35 }
 0x43d   :  { %v1102_v38 = vpop.eup %1101 }
 0x43e   :  { %v593_v42 = vmul.f32 %v1102_v38, %v587_v37  ;;  %v608_v46 = vadd.f32 %v905_v44, %v600_v43 }
 0x440   :  { %v601_v45 = vmul.f32 %v904_v36, %v593_v42 }
 0x442   :  { %v609_v47 = vadd.f32 %v905_v44, %v601_v45 }
 0x444   :  { %v610_v48 = vpack.c.bf16 %v609_v47, %v608_v46 }
 0x446   :  { %1012 = vmatmul.mubr.bf16.vlgmr.msra.gmra.mrb[8].mxu0 %v610_v48 }
 0x519   :  { %v716_v56 = vpop.f32.mrb[8].mxu0 }
 0x51a   :  { %v717_v57 = vadd.f32 %v906_v55, %v716_v56  ;;  %v1013_v58 = vpop.f32.mrb[9].mxu0 }
 0x51b   :  { %v719_v59 = vpop.f32.mrb[10].mxu0 }
 0x51c   :  { %v725_v60 = vmul.f32 0.70710677, %v717_v57  ;;  %v720_v61 = vadd.f32 %v906_v55, %v719_v59  ;;  %v1014_v62 = vpop.f32.mrb[11].mxu0  ;;  %v723_v5 = vmul.f32 0.5, %v717_v57 }
 0x51e   :  { %1103 = verf.f32 %v725_v60  ;;  %v726_v63 = vmul.f32 0.70710677, %v720_v61  ;;  %v724_v6 = vmul.f32 0.5, %v720_v61 }
 0x520   :  { %1105 = verf.f32 %v726_v63 }
 0x528   :  { %v1104_v0 = vpop.eup %1103 }
 0x529   :  { %v729_v3 = vadd.f32 1.0, %v1104_v0 }
 0x52a   :  { %v1106_v4 = vpop.eup %1105 }
 0x52b   :  { %v730_v2 = vadd.f32 1.0, %v1106_v4  ;;  %v731_v39 = vmul.f32 %v729_v3, %v723_v5 }
 0x52d   :  { %v732_v9 = vmul.f32 %v730_v2, %v724_v6 }
 0x52f   :  { %v733_v1 = vpack.c.bf16 %v732_v9, %v731_v39 }
 0x531   :  { %1032 = vmatmul.mubr.bf16.vlgmr.msra.gmra.mrb[8].mxu1 %v733_v1 }
 0x604   :  { %v839_v11 = vpop.f32.mrb[8].mxu1 }
 0x605   :  { %v840_v12 = vadd.f32 %v915_v10, %v839_v11  ;;  %v1033_v13 = vpop.f32.mrb[9].mxu1 }
 0x606   :  { %v842_v41 = vpop.f32.mrb[10].mxu1 }
 0x607   :  { %v856_v15 = vmul.f32 %v849_v14, %v840_v12  ;;  %v843_v40 = vadd.f32 %v915_v10, %v842_v41  ;;  %v1034_v16 = vpop.f32.mrb[11].mxu1 }
 0x609   :  { %v857_v18 = vmul.f32 %v854_v17, %v843_v40  ;;  %v858_v19 = vadd.f32 %v1778_v8, %v856_v15 }
 0x60b   :  { %v859_v20 = vadd.f32 %v1776_v7, %v857_v18 }
 0x60d   :  { %v935_v21 = vpack.c.bf16 %v859_v20, %v858_v19 }
 0x60f   :  { %936 = vst [vmem:[#allocation25] sm:$0xff] %v935_v21  }
 0x610   :  { %1426 = shalt.err (!%p1423_p4)
}
 0x611   :  { %s1427_s1 = scalar_lea.hbm %s1835_s14, 128 }
 0x612   :  { %p1428_p5 = scmp.ne.s32.totalorder %s1835_s14, %s1427_s1  ;;  %p1431_p6 = scmp.lt.u32.totalorder %s1427_s1, %s1835_s14 }
 0x614   :  { %p1433_p7 = pnand %p1431_p6, %p1428_p5 }
 0x616   :  { %1436 = shalt.err (!%p1433_p7)
}
 0x617   :  { %881 = dma.vmem_to_hbm [thread:$0]  %s876_s20, 128, %s1835_s14, [#allocation4], %s1464_s11, %s1464_s11, %s1465_s16  }
 0x618   :  { %1453 = dma.done.wait [#allocation4], 128  }
 0x619   :  { %1454 = vsyncadd [#allocation4], 4294967168 }
 0x61a   :  { %885 = vsyncpa [#allocation3], 1 }
 0x61b   :  { %886 = vsyncpa [#allocation6], 1 }
 0x61c   :  { %887 = vsyncpa [#allocation9], 1 }
 0x61d   :  { %888 = vsyncpa [#allocation12], 1 }
 0x61e   :  { %889 = vsyncpa [#allocation15], 1 }
 0x61f   :  { %890 = vsyncpa [#allocation18], 1 }
 0x620   :  { %891 = vsyncpa [#allocation21], 1 }
 0x621   :  { %892 = vsyncpa [#allocation24], 1 }
 0x622   :  { %893 = vsyncpa [#allocation4], 1 }

</bundles_post_ra>
